<compile_context>
chip_gen: v5e
topology: v5e:2x2
jax: 0.10.0
libtpu: 0.0.40
codegen_flags: <defaults>
</compile_context>

<pallas_src>
import functools

import jax
import jax.numpy as jnp
from jax import lax
from jax.experimental import pallas as pl
from jax.experimental.pallas import tpu as pltpu


# --------------------------------------------------------------------------- #
# Kernel
# --------------------------------------------------------------------------- #
def _folded_conv3x3_kernel(x_ref, w_ref, b_ref, o_ref, *, n_k_groups):
    """One (row-tile, cout-tile) block of ReLU(conv3x3(x; W_eff) + b_eff).

    x_ref: (1, th+2, W+2, Cin)  bf16  padded activation window (1-row halo)
    w_ref: (9*Cin, Cout_pad)    bf16  folded weights, rows ordered (kw, kh, ci)
    b_ref: (1, Cout_pad)        f32   folded BN bias
    o_ref: (1, th, W, tco)      bf16
    """
    _, th, w_img, tco = o_ref.shape
    cin = x_ref.shape[3]
    cout_pad = w_ref.shape[1]

    taps_per_group = 9 // n_k_groups          # 9 (single im2col dot) or 3 (per-kw)
    k_group = taps_per_group * cin

    # Cout tile of the constant (fetched-once) weight / bias blocks.
    if cout_pad == tco:
        col = slice(None)
    else:
        off = pl.multiple_of(pl.program_id(2) * tco, tco)
        col = pl.ds(off, tco)
    b = b_ref[:, col]                         # (1, tco) f32

    acc = None
    for g in range(n_k_groups):
        # Build the im2col LHS for this K-group; tap order (kw, kh) matches the
        # row order of w_ref.  kh offsets are cheap leading-dim slices; the
        # kw in {1,2} sublane offsets feed the im2col copy we need anyway.
        parts = []
        for t in range(taps_per_group):
            tap = g * taps_per_group + t
            kw, kh = tap // 3, tap % 3
            parts.append(x_ref[0, kh:kh + th, kw:kw + w_img, :])
        lhs = jnp.concatenate(parts, axis=-1).reshape(th * w_img, k_group)
        w_g = w_ref[g * k_group:(g + 1) * k_group, col]
        part = jnp.dot(lhs, w_g, preferred_element_type=jnp.float32)
        acc = part if acc is None else acc + part   # 0 or 2 adds total

    out = jnp.maximum(acc + b, 0.0)                 # (th*W, tco) + (1, tco)
    o_ref[0] = out.astype(o_ref.dtype).reshape(th, w_img, tco)


# --------------------------------------------------------------------------- #
# Per-generation tiling
# --------------------------------------------------------------------------- #
def _device_kind():
    try:
        return jax.devices()[0].device_kind.lower()
    except Exception:
        return ""


def _vmem_capacity_bytes():
    try:
        cap = int(pltpu.get_tpu_info().vmem_capacity_bytes)
        if cap > 0:
            return cap
    except Exception:
        pass
    kind = _device_kind()
    return (64 << 20) if "7" in kind else (128 << 20)   # v7x: 64 MiB, else 128 MiB


def _per_step_vmem_bytes(th, w, cin, tco, cout_pad, k_taps):
    """Double-buffered pipeline blocks + in-kernel temporaries for one step."""
    x_blk = (th + 2) * (w + 2) * cin * 2          # bf16 activation window
    o_blk = th * w * tco * 2                      # bf16 output tile
    w_blk = 9 * cin * cout_pad * 2                # full folded weights (const idx)
    b_blk = cout_pad * 4
    blocks = 2 * (x_blk + o_blk + w_blk + b_blk)
    im2col = 2 * th * w * k_taps * cin * 2        # concat buffer + slab transients
    acc = th * w * tco * (4 + 4 + 2)              # f32 acc + f32 partial + bf16 epi
    return blocks + im2col + acc


def _pick_tiles(h, w, cin, cout_pad, vmem_cap, is_v5e):
    # v5e MXUs are 4x128^2: a 256-wide cout tile only adds accumulator pressure.
    tco = 128 if (is_v5e or cout_pad % 256 != 0) else 256
    # Single K=9*Cin dot for small/medium Cin (recovers MXU depth for Cin=3/4);
    # per-kw groups (K=3*Cin) for large Cin to keep the im2col buffer small.
    n_k_groups = 1 if cin <= 128 else 3
    k_taps = 9 // n_k_groups
    budget = min(int(vmem_cap * 0.6), vmem_cap - (16 << 20))
    th = 1
    for cand in sorted((d for d in range(1, h + 1) if h % d == 0), reverse=True):
        if _per_step_vmem_bytes(cand, w, cin, tco, cout_pad, k_taps) <= budget:
            th = cand
            break
    need = _per_step_vmem_bytes(th, w, cin, tco, cout_pad, k_taps)
    return th, tco, n_k_groups, need


# --------------------------------------------------------------------------- #
# Wrapper
# --------------------------------------------------------------------------- #
@jax.jit
def linear_add_block(x_nchw, w3, w1, s_conv, s_1x1, s_id,
                     bn_gamma, bn_beta, bn_mean, bn_var, eps=1e-5):
    """LinearAddBlock forward (eval mode, stride=1): (N,Cin,H,W) -> (N,Cout,H,W) bf16."""
    N, Cin, H, W = x_nchw.shape
    Cout = w3.shape[0]
    has_identity = (Cin == Cout) and (s_id is not None)   # stride == 1 assumed

    # ---- fold scales + 1x1 + identity + BN into one 3x3 conv + bias ---------
    bn_a = (bn_gamma / jnp.sqrt(bn_var + eps)).astype(jnp.float32)
    bn_b = (bn_beta - bn_mean * bn_a).astype(jnp.float32)
    w_eff = w3.astype(jnp.float32) * (s_conv * bn_a)[:, None, None, None]
    w_eff = w_eff.at[:, :, 1, 1].add(
        w1[:, :, 0, 0].astype(jnp.float32) * (s_1x1 * bn_a)[:, None])
    if has_identity:
        w_eff = w_eff.at[:, :, 1, 1].add(
            jnp.eye(Cout, dtype=jnp.float32) * (s_id * bn_a)[:, None])

    # (Cout,Cin,kh,kw) -> (kw,kh,Cin,Cout) -> (9*Cin, Cout_pad): row order matches
    # the kernel's im2col tap order; Cout padded to a lane-dense multiple of 128.
    cout_pad = -(-Cout // 128) * 128
    w_k = jnp.transpose(w_eff, (3, 2, 1, 0)).reshape(9 * Cin, Cout)
    w_k = jnp.pad(w_k, ((0, 0), (0, cout_pad - Cout))).astype(jnp.bfloat16)
    bias = jnp.pad(bn_b, (0, cout_pad - Cout)).reshape(1, cout_pad)

    # ---- per-generation tiling / VMEM budget ---------------------------------
    kind = _device_kind()
    vmem_cap = _vmem_capacity_bytes()
    th, tco, n_k_groups, need = _pick_tiles(
        H, W, Cin, cout_pad, vmem_cap, is_v5e="v5" in kind)
    nrt = H // th
    ncot = cout_pad // tco
    vmem_limit = int(min(max(need + (8 << 20), 32 << 20), vmem_cap - (8 << 20)))

    # ---- activation: NHWC bf16 + spatial zero pad (single fused pass) --------
    x_pad = jnp.pad(jnp.transpose(x_nchw, (0, 2, 3, 1)).astype(jnp.bfloat16),
                    ((0, 0), (1, 1), (1, 1), (0, 0)))

    # Overlapping (th+2)-row halo windows come straight out of x_pad: full-H
    # block when it fits, otherwise element-offset windows on the H axis (no
    # duplicated activation copy in HBM).
    if nrt == 1:
        x_spec = pl.BlockSpec((1, H + 2, W + 2, Cin),
                              lambda n, r, c: (n, 0, 0, 0))
    else:
        x_spec = pl.BlockSpec((1, pl.Element(th + 2), W + 2, Cin),
                              lambda n, r, c: (n, r * th, 0, 0))

    cost = pl.CostEstimate(
        flops=2 * N * H * W * cout_pad * 9 * Cin,
        transcendentals=0,
        bytes_accessed=int(x_pad.size * 2 + w_k.size * 2 + bias.size * 4
                           + N * H * W * cout_pad * 2))

    out_nhwc = pl.pallas_call(
        functools.partial(_folded_conv3x3_kernel, n_k_groups=n_k_groups),
        out_shape=jax.ShapeDtypeStruct((N, H, W, cout_pad), jnp.bfloat16),
        grid_spec=pltpu.PrefetchScalarGridSpec(
            num_scalar_prefetch=0,
            grid=(N, nrt, ncot),
            in_specs=[
                x_spec,
                # Constant block index -> weights / bias DMA'd once and reused;
                # the cout tile is sliced in-kernel.
                pl.BlockSpec((9 * Cin, cout_pad), lambda n, r, c: (0, 0)),
                pl.BlockSpec((1, cout_pad), lambda n, r, c: (0, 0)),
            ],
            out_specs=pl.BlockSpec((1, th, W, tco),
                                   lambda n, r, c: (n, r, 0, c)),
        ),
        compiler_params=pltpu.CompilerParams(
            dimension_semantics=("parallel", "parallel", "parallel"),
            vmem_limit_bytes=vmem_limit),
        cost_estimate=cost,
    )(x_pad, w_k, bias)

    # Back to the module's NCHW interface, staying in bf16 (cast at the caller
    # if f32 is required; an NHWC end-to-end model would skip this transpose).
    return jnp.transpose(out_nhwc[..., :Cout], (0, 3, 1, 2))


# --------------------------------------------------------------------------- #
# Pure-JAX reference
# --------------------------------------------------------------------------- #
def _reference(x_nchw, w3, w1, s_conv, s_1x1, s_id,
               bn_gamma, bn_beta, bn_mean, bn_var, eps=1e-5):
    dn = ("NCHW", "OIHW", "NCHW")
    c3 = lax.conv_general_dilated(x_nchw, w3, (1, 1), ((1, 1), (1, 1)),
                                  dimension_numbers=dn)
    c1 = lax.conv_general_dilated(x_nchw, w1, (1, 1), ((0, 0), (0, 0)),
                                  dimension_numbers=dn)
    bc = lambda v: v[None, :, None, None]
    out = c3 * bc(s_conv) + c1 * bc(s_1x1) + x_nchw * bc(s_id)
    out = (out - bc(bn_mean)) / jnp.sqrt(bc(bn_var) + eps) * bc(bn_gamma) + bc(bn_beta)
    return jnp.maximum(out, 0.0)


if __name__ == "__main__":
    key = jax.random.PRNGKey(0)
    N, C, H, W = 2, 4, 16, 16          # in_channels == out_channels, stride=1
    ks = jax.random.split(key, 8)

    x = jax.random.normal(ks[0], (N, C, H, W), jnp.float32)
    w3 = jax.random.normal(ks[1], (C, C, 3, 3), jnp.float32) * 0.1
    w1 = jax.random.normal(ks[2], (C, C, 1, 1), jnp.float32) * 0.1
    conv_scale_init = 0.5
    s_conv = jnp.full((C,), conv_scale_init, jnp.float32)     # ScaleLayer(scale_init)
    s_1x1 = jnp.full((C,), conv_scale_init, jnp.float32)
    s_id = jnp.ones((C,), jnp.float32)                        # ScaleLayer(scale_init=1.0)
    bn_gamma = 1.0 + 0.1 * jax.random.normal(ks[3], (C,), jnp.float32)
    bn_beta = 0.1 * jax.random.normal(ks[4], (C,), jnp.float32)
    bn_mean = 0.1 * jax.random.normal(ks[5], (C,), jnp.float32)
    bn_var = jnp.abs(jax.random.normal(ks[6], (C,), jnp.float32)) + 0.5

    out = linear_add_block(x, w3, w1, s_conv, s_1x1, s_id,
                           bn_gamma, bn_beta, bn_mean, bn_var)
    out = jax.block_until_ready(out)

    ref = _reference(x, w3, w1, s_conv, s_1x1, s_id,
                     bn_gamma, bn_beta, bn_mean, bn_var)
    assert out.shape == (N, C, H, W)
    out_f32 = out.astype(jnp.float32)
    # bf16 MXU inputs + bf16 output storage with f32 accumulation.
    err = float(jnp.max(jnp.abs(out_f32 - ref)))
    assert jnp.allclose(out_f32, ref, atol=7.5e-2, rtol=5e-2), err

    print("KERNEL_OK")
</pallas_src>

<mosaic_0001>
module attributes {stable_mosaic.version = 11 : i64} {
  func.func @_folded_conv3x3_kernel(%arg0: i32, %arg1: i32, %arg2: i32, %arg3: memref<1x18x18x4xbf16, #tpu.memory_space<vmem>>, %arg4: memref<36x128xbf16, #tpu.memory_space<vmem>>, %arg5: memref<1x128xf32, #tpu.memory_space<vmem>>, %arg6: memref<1x16x16x128xbf16, #tpu.memory_space<vmem>>) attributes {dimension_semantics = [#tpu.dimension_semantics<parallel>, #tpu.dimension_semantics<parallel>, #tpu.dimension_semantics<parallel>], iteration_bounds = array<i64: 2, 1, 1>, scalar_prefetch = 0 : i64, scratch_operands = 0 : i64, tpu.core_type = #tpu.core_type<tc>, window_params = [{transform_indices = @transform_0, window_bounds = array<i64: 1, 18, 18, 4>}, {pipeline_mode = #tpu.pipeline_mode<synchronous>, transform_indices = @transform_1, window_bounds = array<i64: 36, 128>}, {pipeline_mode = #tpu.pipeline_mode<synchronous>, transform_indices = @transform_2, window_bounds = array<i64: 1, 128>}, {transform_indices = @transform_3, window_bounds = array<i64: 1, 16, 16, 128>}]} {
    %c0 = arith.constant 0 : index
    %c0_0 = arith.constant 0 : index
    %0 = vector.load %arg5[%c0, %c0_0] : memref<1x128xf32, #tpu.memory_space<vmem>>, vector<1x128xf32>
    %c0_1 = arith.constant 0 : index
    %c0_2 = arith.constant 0 : index
    %c0_3 = arith.constant 0 : index
    %c0_4 = arith.constant 0 : index
    %1 = vector.load %arg3[%c0_1, %c0_2, %c0_3, %c0_4] : memref<1x18x18x4xbf16, #tpu.memory_space<vmem>>, vector<1x16x16x4xbf16>
    %2 = vector.shape_cast %1 : vector<1x16x16x4xbf16> to vector<16x16x4xbf16>
    %c0_5 = arith.constant 0 : index
    %c1 = arith.constant 1 : index
    %c0_6 = arith.constant 0 : index
    %c0_7 = arith.constant 0 : index
    %3 = vector.load %arg3[%c0_5, %c1, %c0_6, %c0_7] : memref<1x18x18x4xbf16, #tpu.memory_space<vmem>>, vector<1x16x16x4xbf16>
    %4 = vector.shape_cast %3 : vector<1x16x16x4xbf16> to vector<16x16x4xbf16>
    %c0_8 = arith.constant 0 : index
    %c2 = arith.constant 2 : index
    %c0_9 = arith.constant 0 : index
    %c0_10 = arith.constant 0 : index
    %5 = vector.load %arg3[%c0_8, %c2, %c0_9, %c0_10] : memref<1x18x18x4xbf16, #tpu.memory_space<vmem>>, vector<1x16x16x4xbf16>
    %6 = vector.shape_cast %5 : vector<1x16x16x4xbf16> to vector<16x16x4xbf16>
    %c0_11 = arith.constant 0 : index
    %c0_12 = arith.constant 0 : index
    %c1_13 = arith.constant 1 : index
    %c0_14 = arith.constant 0 : index
    %7 = vector.load %arg3[%c0_11, %c0_12, %c1_13, %c0_14] : memref<1x18x18x4xbf16, #tpu.memory_space<vmem>>, vector<1x16x16x4xbf16>
    %8 = vector.shape_cast %7 : vector<1x16x16x4xbf16> to vector<16x16x4xbf16>
    %c0_15 = arith.constant 0 : index
    %c1_16 = arith.constant 1 : index
    %c1_17 = arith.constant 1 : index
    %c0_18 = arith.constant 0 : index
    %9 = vector.load %arg3[%c0_15, %c1_16, %c1_17, %c0_18] : memref<1x18x18x4xbf16, #tpu.memory_space<vmem>>, vector<1x16x16x4xbf16>
    %10 = vector.shape_cast %9 : vector<1x16x16x4xbf16> to vector<16x16x4xbf16>
    %c0_19 = arith.constant 0 : index
    %c2_20 = arith.constant 2 : index
    %c1_21 = arith.constant 1 : index
    %c0_22 = arith.constant 0 : index
    %11 = vector.load %arg3[%c0_19, %c2_20, %c1_21, %c0_22] : memref<1x18x18x4xbf16, #tpu.memory_space<vmem>>, vector<1x16x16x4xbf16>
    %12 = vector.shape_cast %11 : vector<1x16x16x4xbf16> to vector<16x16x4xbf16>
    %c0_23 = arith.constant 0 : index
    %c0_24 = arith.constant 0 : index
    %c2_25 = arith.constant 2 : index
    %c0_26 = arith.constant 0 : index
    %13 = vector.load %arg3[%c0_23, %c0_24, %c2_25, %c0_26] : memref<1x18x18x4xbf16, #tpu.memory_space<vmem>>, vector<1x16x16x4xbf16>
    %14 = vector.shape_cast %13 : vector<1x16x16x4xbf16> to vector<16x16x4xbf16>
    %c0_27 = arith.constant 0 : index
    %c1_28 = arith.constant 1 : index
    %c2_29 = arith.constant 2 : index
    %c0_30 = arith.constant 0 : index
    %15 = vector.load %arg3[%c0_27, %c1_28, %c2_29, %c0_30] : memref<1x18x18x4xbf16, #tpu.memory_space<vmem>>, vector<1x16x16x4xbf16>
    %16 = vector.shape_cast %15 : vector<1x16x16x4xbf16> to vector<16x16x4xbf16>
    %c0_31 = arith.constant 0 : index
    %c2_32 = arith.constant 2 : index
    %c2_33 = arith.constant 2 : index
    %c0_34 = arith.constant 0 : index
    %17 = vector.load %arg3[%c0_31, %c2_32, %c2_33, %c0_34] : memref<1x18x18x4xbf16, #tpu.memory_space<vmem>>, vector<1x16x16x4xbf16>
    %18 = vector.shape_cast %17 : vector<1x16x16x4xbf16> to vector<16x16x4xbf16>
    %19 = tpu.concatenate %2, %4, %6, %8, %10, %12, %14, %16, %18 in 2 : vector<16x16x4xbf16>, vector<16x16x4xbf16>, vector<16x16x4xbf16>, vector<16x16x4xbf16>, vector<16x16x4xbf16>, vector<16x16x4xbf16>, vector<16x16x4xbf16>, vector<16x16x4xbf16>, vector<16x16x4xbf16> -> vector<16x16x36xbf16>
    %20 = vector.shape_cast %19 : vector<16x16x36xbf16> to vector<256x36xbf16>
    %c0_35 = arith.constant 0 : index
    %c0_36 = arith.constant 0 : index
    %21 = vector.load %arg4[%c0_35, %c0_36] : memref<36x128xbf16, #tpu.memory_space<vmem>>, vector<36x128xbf16>
    %cst = arith.constant dense<0.000000e+00> : vector<256x128xf32>
    %22 = tpu.matmul %20, %21, %cst {dimension_numbers = #tpu.dot_dimension_numbers<[1], [0], [0], [1], [0, 0, 1, 1], [], []>} : vector<256x36xbf16>, vector<36x128xbf16>, vector<256x128xf32> -> vector<256x128xf32>
    %23 = vector.broadcast %0 : vector<1x128xf32> to vector<256x128xf32>
    %24 = arith.addf %22, %23 : vector<256x128xf32>
    %cst_37 = arith.constant 0.000000e+00 : f32
    %25 = vector.broadcast %cst_37 : f32 to vector<256x128xf32>
    %26 = arith.maximumf %24, %25 : vector<256x128xf32>
    %27 = arith.truncf %26 : vector<256x128xf32> to vector<256x128xbf16>
    %28 = vector.shape_cast %27 : vector<256x128xbf16> to vector<16x16x128xbf16>
    %c0_38 = arith.constant 0 : index
    %c0_39 = arith.constant 0 : index
    %c0_40 = arith.constant 0 : index
    %c0_41 = arith.constant 0 : index
    %29 = vector.load %arg6[%c0_38, %c0_39, %c0_40, %c0_41] : memref<1x16x16x128xbf16, #tpu.memory_space<vmem>>, vector<1x16x16x128xbf16>
    %30 = vector.shape_cast %29 : vector<1x16x16x128xbf16> to vector<16x16x128xbf16>
    %31 = vector.shape_cast %28 : vector<16x16x128xbf16> to vector<1x16x16x128xbf16>
    tpu.vector_store %arg6[%c0_38, %c0_39, %c0_40, %c0_41], %31 {strides = array<i32>} : memref<1x16x16x128xbf16, #tpu.memory_space<vmem>>, vector<1x16x16x128xbf16>,
    return
  }
  func.func @transform_0(%arg0: i32, %arg1: i32, %arg2: i32) -> (i32, i32, i32, i32) {
    %c0_i32 = arith.constant 0 : i32
    %c0_i32_0 = arith.constant 0 : i32
    %c0_i32_1 = arith.constant 0 : i32
    %c0_i32_2 = arith.constant 0 : i32
    return %arg0, %c0_i32, %c0_i32_0, %c0_i32_1 : i32, i32, i32, i32
  }
  func.func @transform_1(%arg0: i32, %arg1: i32, %arg2: i32) -> (i32, i32) {
    %c0_i32 = arith.constant 0 : i32
    %c0_i32_0 = arith.constant 0 : i32
    %c0_i32_1 = arith.constant 0 : i32
    return %c0_i32, %c0_i32_0 : i32, i32
  }
  func.func @transform_2(%arg0: i32, %arg1: i32, %arg2: i32) -> (i32, i32) {
    %c0_i32 = arith.constant 0 : i32
    %c0_i32_0 = arith.constant 0 : i32
    %c0_i32_1 = arith.constant 0 : i32
    return %c0_i32, %c0_i32_0 : i32, i32
  }
  func.func @transform_3(%arg0: i32, %arg1: i32, %arg2: i32) -> (i32, i32, i32, i32) {
    %c0_i32 = arith.constant 0 : i32
    %c0_i32_0 = arith.constant 0 : i32
    return %arg0, %arg1, %c0_i32, %arg2 : i32, i32, i32, i32
  }
}

</mosaic_0001>

<bundles_post_ra>
// kernel: linear_add_block.1
= control target key start
LH: loop header
LB: loop body
LE: loop exit
PB: predicated region body
PF: predicated region fallthrough
CT: control target
= control target key end

     0   :  { %s3145_s12 = smov 0   ;;  %s3147_s13 = smov 0   ;;  %s4445_s0 = inlined_call_operand.vmem [shape: bf16[2,18,18,4], index: 0, kind: input, shape index: {}]   ;;  %s4446_s1 = inlined_call_operand.vmem [shape: bf16[36,128], index: 1, kind: input, shape index: {}]   ;;  %s4447_s2 = inlined_call_operand.vmem [shape: f32[1,128], index: 2, kind: input, shape index: {}]   ;;  %s4448_s3 = inlined_call_operand.vmem [shape: bf16[2,16,16,128], index: 3, kind: output, shape index: {}]  }
   0x1   :  { %s3149_s14 = smov 0  }
   0x2 LB: > { %s32_s15 = sadd.s32 1, %s3111_s13  ;;  %p2526_p0 = scmp.ge.s32.totalorder %s3115_s14, 1  ;;  %s3115_s14 = sphi %s3149_s14, %s13_s14   ;;  %s3111_s13 = sphi %s3147_s13, %s4563_s13   ;;  %s3107_s12 = sphi %s3145_s12, %s4562_s12  }
   0x3   : > { %p34_p1 = scmp.ge.s32.totalorder %s32_s15, 2  ;;  %p160_p2 = scmp.lt.s32.totalorder %s3115_s14, 3 }
   0x5   : > { %s4565_s15 = smov (%p34_p1, %s32_s15), 0  ;;  %p161_p3 = pnand %p2526_p0, %p160_p2 }
   0x7   : > { %164 = sbr.rel (%p161_p3) target bundleno = 613 (0x265), region = 32 }
   0xc   : > { %p192_p4 = scmp.lt.s32.totalorder %s3107_s12, 1  ;;  %s3117_s20 = smov 4   ;;  %vm759_vm0 = vsmask.f32 7424  ;;  %vm1913_vm1 = vcmask 31744   ;;  %vm1946_vm2 = vcmask 64512  }
   0xd   : > { %s3118_s21 = smov 8   ;;  %s3119_s22 = smov 12   ;;  %vm1576_vm3 = vcmask 1046528   ;;  %vm1979_vm4 = vcmask 97280   ;;  %vm2233_vm5 = vcmask 1041408   ;;  %vm2012_vm6 = vcmask 130048  }
   0xe   : > { %s4567_s12 = smov (!%p192_p4, %s3107_s12), 1  ;;  %s3120_s23 = smov 16   ;;  %vm2045_vm7 = vcmask 162816   ;;  %vm2078_vm8 = vcmask 195584   ;;  %vm2111_vm9 = vcmask 228352   ;;  %vm2144_vm10 = vcmask 261120  }
   0xf   : > { %s2982_s16 = smul.u32 216, %s4567_s12  ;;  %s3121_s24 = smov 20   ;;  %vm2200_vm11 = vcmask 293888  }
  0x10   : > { %s3122_s25 = smov 24   ;;  %s3123_s26 = smov 28  }
  0x11   : > { %s3169_s19 = scalar_lea.vmem %s4445_s0, %s2982_s16  ;;  %s3124_s27 = smov 32  }
  0x12   : > { %v3172_v0 = vld [vmem:[%s3169_s19 + $0x48] sm:$0xff]   ;;  %v3175_v1 = vld [vmem:[%s3169_s19 + $0x30] sm:$0xff]   ;;  %v3178_v2 = vld [vmem:[%s3169_s19 + $0x18] sm:$0xff]   ;;  %s2684_s9 = sshll.u32 %s4567_s12, 7 }
  0x13   : > { %577 = vrot.lane.b32.xlu2 %v3172_v0, %s3117_s20  ;;  %573 = vrot.lane.b32.xlu1 %v3175_v1, %s3117_s20  ;;  %v3185_v3 = vld [vmem:[%s3169_s19 + $0x3c] sm:$0xff]   ;;  %v3191_v5 = vld [vmem:[%s3169_s19 + $0x24] sm:$0xff]   ;;  %v1047_v60 = vshll.u32 %v3178_v2, 16  ;;  %s4362_s16 = scalar_lea.vmem %s4448_s3, %s2684_s9 }
  0x14   : > { %v3188_v4 = vld [vmem:[%s3169_s19 + $0x3c] sm:$0xf0]  ;;  %4483 = vst [vmem:[#allocation2_spill] sm:$0xff] %v3191_v5  ;;  %v3194_v6 = vld [vmem:[%s3169_s19 + $0x24] sm:$0xf0]  ;;  %569 = vrot.lane.b32.xlu0 %v3178_v2, %s3117_s20  ;;  %v3199_v7 = vld [vmem:[%s3169_s19 + $0xc] sm:$0xff]  }
  0x15   : > { %4484 = vst [vmem:[#allocation3_spill] sm:$0xff] %v3194_v6  ;;  %v3202_v8 = vld [vmem:[%s3169_s19 + $0xc] sm:$0xf0]  ;;  %v3211_v11 = vld [vmem:[%s3169_s19 + $0x54] sm:$0xff]   ;;  %v3223_v13 = vld [vmem:[%s3169_s19 + $0x60] sm:$0xff]  }
  0x16   : > { %v3205_v9 = vld [vmem:[%s3169_s19 + $0x6c] sm:$0xff]   ;;  %4485 = vst [vmem:[#allocation4_spill] sm:$0xff] %v3211_v11  ;;  %v3214_v12 = vld [vmem:[%s3169_s19 + $0x54] sm:$0xf0]  ;;  %v3226_v14 = vld [vmem:[%s3169_s19 + $0x84] sm:$0xff]  }
  0x17   : > { %v3208_v10 = vld [vmem:[%s3169_s19 + $0x6c] sm:$0xf0]  ;;  %4486 = vst [vmem:[#allocation5_spill] sm:$0xff] %v3214_v12  ;;  %v3229_v15 = vld [vmem:[%s3169_s19 + $0x84] sm:$0xf0]  ;;  %v3241_v17 = vld [vmem:[%s3169_s19 + $0xb4] sm:$0xff]  }
  0x18   : > { %4487 = vst [vmem:[#allocation6_spill] sm:$0xff] %v3226_v14  ;;  %v3238_v16 = vld [vmem:[%s3169_s19 + $0x90] sm:$0xff]   ;;  %v3244_v18 = vld [vmem:[%s3169_s19 + $0xb4] sm:$0xf0]  ;;  %v3250_v20 = vld [vmem:[%s3169_s19 + $0x9c] sm:$0xff]  }
  0x19   : > { %4488 = vst [vmem:[#allocation7_spill] sm:$0xff] %v3229_v15  ;;  %v3247_v19 = vld [vmem:[%s3169_s19 + $0x78] sm:$0xff]   ;;  %v3253_v21 = vld [vmem:[%s3169_s19 + $0x9c] sm:$0xf0]  ;;  %v3262_v22 = vld [vmem:[%s3169_s19 + $0xa8] sm:$0xff]  }
  0x1a   : > { %4489 = vst [vmem:[#allocation8_spill] sm:$0xff] %v3241_v17  ;;  %v3265_v23 = vld [vmem:[%s3169_s19 + $0x24] sm:$0xff]   ;;  %v3277_v25 = vld [vmem:[%s3169_s19 + $0x3c] sm:$0xff]   ;;  %v3292_v28 = vld [vmem:[%s3169_s19 + $0x6c] sm:$0xff]  }
  0x1b   : > { %575 = vrot.lane.b32.xlu2 %v3185_v3, %s3117_s20  ;;  %571 = vrot.lane.b32.xlu1 %v3191_v5, %s3117_s20  ;;  %4490 = vst [vmem:[#allocation9_spill] sm:$0xff] %v3244_v18  ;;  %v3268_v24 = vld [vmem:[%s3169_s19 + $0x24] sm:$0xf0]  ;;  %v3280_v26 = vld [vmem:[%s3169_s19 + $0x3c] sm:$0xf0] }
  0x1c   : > { %567 = vrot.lane.b32.xlu0 %v3199_v7, %s3117_s20  ;;  %4491 = vst [vmem:[#allocation10_spill] sm:$0xff] %v3265_v23  ;;  %v3283_v27 = vld [vmem:[%s3169_s19 + $0xc0] sm:$0xff]   ;;  %v3295_v29 = vld [vmem:[%s3169_s19 + $0x6c] sm:$0xf0]  ;;  %v3298_v30 = vld [vmem:[%s3169_s19 + $0x54] sm:$0xff]  }
  0x1d   : > { %4492 = vst [vmem:[#allocation11_spill] sm:$0xff] %v3268_v24  ;;  %v3301_v31 = vld [vmem:[%s3169_s19 + $0x54] sm:$0xf0]  ;;  %v3310_v32 = vld [vmem:[%s3169_s19 + $0x84] sm:$0xff]   ;;  %v3332_v39 = vld [vmem:[%s3169_s19 + $0x9c] sm:$0xff]  }
  0x1e   : > { %4493 = vst [vmem:[#allocation12_spill] sm:$0xff] %v3277_v25  ;;  %v3313_v33 = vld [vmem:[%s3169_s19 + $0x84] sm:$0xf0]  ;;  %v3323_v35 = vld [vmem:[%s3169_s19 + $0xb4] sm:$0xff]   ;;  %v3329_v38 = vld [vmem:[%s3169_s19] sm:$0xff]  }
  0x1f   : > { %4494 = vst [vmem:[#allocation13_spill] sm:$0xff] %v3280_v26  ;;  %v311_v34 = vld [vmem:[%s3169_s19 + $0x8] sm:$0x1]  ;;  %v3326_v36 = vld [vmem:[%s3169_s19 + $0xb4] sm:$0xf0]  ;;  %v3344_v43 = vld [vmem:[%s3169_s19 + $0xc] sm:$0xff]  }
  0x20   : > { %4495 = vst [vmem:[#allocation14_spill] sm:$0xff] %v3292_v28  ;;  %v727_v37 = vunpack.c.l.b16 %v311_v34  ;;  %v3335_v40 = vld [vmem:[%s3169_s19 + $0x9c] sm:$0xf0]  ;;  %v3338_v41 = vld [vmem:[%s3169_s19 + $0x24] sm:$0xff]   ;;  %v3347_v44 = vld [vmem:[%s3169_s19 + $0xc] sm:$0xf0] }
  0x21   : > { %4496 = vst [vmem:[#allocation15_spill] sm:$0xff] %v3295_v29  ;;  %v3341_v42 = vld [vmem:[%s3169_s19 + $0x24] sm:$0xf0]  ;;  %v763_v46 = vshll.u32 %v3329_v38, 16  ;;  %v313_v47 = vld [vmem:[%s3169_s19 + $0x20] sm:$0x1] }
  0x22   : > { %4497 = vst [vmem:[#allocation16_spill] sm:$0xff] %v3298_v30  ;;  %v3353_v45 = vpack.c.b16 %v727_v37, %v727_v37  ;;  %v314_v48 = vld [vmem:[%s3169_s19 + $0x2c] sm:$0x1]  ;;  %v312_v49 = vld [vmem:[%s3169_s19 + $0x14] sm:$0x1]  ;;  %v761_v52 = vshrl.u32 %v3329_v38, 16  ;;  %v729_v55 = vunpack.c.l.b16 %v313_v47 }
  0x23   : > { %583 = vrot.lane.b32.xlu2 %v3205_v9, %s3117_s20  ;;  %581 = vrot.lane.b32.xlu1 %v3223_v13, %s3117_s20  ;;  %4498 = vst [vmem:[#allocation17_spill] sm:$0xff] %v3301_v31  ;;  %v3362_v50 = vld [vmem:[%s3169_s19 + $0xcc] sm:$0xff]   ;;  %v765_v53 = vrot.slane %v763_v46, 1  ;;  %v3370_v56 = vld [vmem:[%s3169_s19 + $0x3c] sm:$0xff]   ;;  %v730_v58 = vunpack.c.l.b16 %v314_v48  ;;  %v728_v59 = vunpack.c.l.b16 %v312_v49  ;;  %v1093_v37 = vshrl.u32 %v3172_v0, 16 }
  0x24   : > { %579 = vrot.lane.b32.xlu0 %v3211_v11, %s3117_s20  ;;  %4499 = vst [vmem:[#allocation18_spill] sm:$0xff] %v3326_v36  ;;  %v3365_v51 = vld [vmem:[%s3169_s19 + $0xcc] sm:$0xf0]  ;;  %v768_v54 = vshll.u32 %v3353_v45, 16  ;;  %v3373_v57 = vld [vmem:[%s3169_s19 + $0x3c] sm:$0xf0]  ;;  %v3380_v63 = vpack.c.b16 %v729_v55, %v729_v55 }
  0x25   : > { %4500 = vst [vmem:[#allocation19_spill] sm:$0xff] %v3332_v39  ;;  %v766_v61 = vor.u32 %v765_v53, %v761_v52  ;;  %v316_v34 = vld [vmem:[%s3169_s19 + $0x44] sm:$0x1]  ;;  %v3386_v46 = vpack.c.b16 %v730_v58, %v730_v58  ;;  %v799_v47 = vshll.u32 %v3338_v41, 16  ;;  %v315_v48 = vld [vmem:[%s3169_s19 + $0x38] sm:$0x1]  ;;  %v3392_v53 = vpack.c.b16 %v728_v59, %v728_v59 }
  0x26   : > { %4501 = vst [vmem:[#allocation20_spill] sm:$0xff] %v3335_v40  ;;  %v770_v62 = vrot.slane %v768_v54, 1  ;;  %v1095_v49 = vshll.u32 %v3172_v0, 16  ;;  %v1071_v52 = vshll.u32 %v3175_v1, 16  ;;  %v775_v54 = vshll.u32 %v3344_v43, 16 }
  0x27   : > { %4502 = vst [vmem:[#allocation21_spill] sm:$0xff] %v3341_v42  ;;  %v317_v55 = vld [vmem:[%s3169_s19 + $0x50] sm:$0x1]  ;;  %v1045_v26 = vshrl.u32 %v3178_v2, 16  ;;  %v1049_v29 = vrot.slane %v1047_v60, 1  ;;  %v732_v42 = vunpack.c.l.b16 %v316_v34  ;;  %v804_v59 = vshll.u32 %v3386_v46, 16 }
  0x28   : > { %4503 = vst [vmem:[#allocation22_spill] sm:$0xff] %v3347_v44  ;;  %v771_v58 = vsel %vm759_vm0, %v766_v61, %v770_v62  ;;  %v733_v40 = vunpack.c.l.b16 %v317_v55  ;;  %v3405_v12 = vld [vmem:[%s3169_s19 + $0x6c] sm:$0xf0]  ;;  %v1069_v60 = vshrl.u32 %v3175_v1, 16  ;;  %v773_v61 = vshrl.u32 %v3344_v43, 16  ;;  %v3414_v55 = vld [vmem:[%s3169_s19 + $0x54] sm:$0xff]  }
  0x29   : > { %4504 = vst [vmem:[#allocation23_spill] sm:$0xff] %v3362_v50  ;;  %v777_v62 = vrot.slane %v775_v54, 1  ;;  %v780_v34 = vshll.u32 %v3392_v53, 16  ;;  %v3410_v6 = vpack.c.b16 %v732_v42, %v732_v42  ;;  %v3419_v11 = vor.u32 %v1049_v29, %v1045_v26  ;;  %v320_v26 = vld [vmem:[%s3169_s19 + $0x74] sm:$0x1] }
  0x2a   : > { %4505 = vst [vmem:[#allocation24_spill] sm:$0xff] %v3365_v51  ;;  %v801_v51 = vrot.slane %v799_v47, 1  ;;  %v823_v47 = vshll.u32 %v3370_v56, 16  ;;  %v806_v5 = vrot.slane %v804_v59, 1  ;;  %v3429_v18 = vpack.c.b16 %v733_v40, %v733_v40  ;;  %v318_v31 = vld [vmem:[%s3169_s19 + $0x5c] sm:$0x1] }
  0x2b   : > { %589 = vrot.lane.b32.xlu2 %v3238_v16, %s3117_s20  ;;  %587 = vrot.lane.b32.xlu1 %v3226_v14, %s3117_s20  ;;  %4506 = vst [vmem:[#allocation25_spill] sm:$0xff] %v3373_v57  ;;  %v778_v29 = vor.u32 %v777_v62, %v773_v61  ;;  %v1119_v40 = vshll.u32 %v3223_v13, 16 }
  0x2c   : > { %585 = vrot.lane.b32.xlu0 %v3247_v19, %s3117_s20  ;;  %4507 = vst [vmem:[#allocation26_spill] sm:$0xff] %v3380_v63  ;;  %v825_v15 = vrot.slane %v823_v47, 1  ;;  %v840_v59 = vshll.u32 %v3429_v18, 16  ;;  %v3447_v47 = vld [vmem:[%s3169_s19 + $0x84] sm:$0xff]  }
  0x2d   : > { %4508 = vst [vmem:[#allocation27_spill] sm:$0xff] %v3386_v46  ;;  %v3417_v46 = vld [vmem:[%s3169_s19 + $0x54] sm:$0xf0] }
  0x2e   : > { %4509 = vst [vmem:[#allocation28_spill] sm:$0xff] %v3392_v53  ;;  %v324_v53 = vld [vmem:[%s3169_s19 + $0xa4] sm:$0x1] }
  0x2f   : > { %4510 = vst [vmem:[#allocation29_spill] sm:$0xff] %v3410_v6  ;;  %v740_v57 = vunpack.c.l.b16 %v324_v53 }
  0x30   : > { %4511 = vst [vmem:[#allocation30_spill] sm:$0xff] %v3417_v46  ;;  %v782_v46 = vrot.slane %v780_v34, 1  ;;  %v734_v34 = vunpack.c.l.b16 %v318_v31 }
  0x31   : > { %4512 = vst [vmem:[#allocation31_spill] sm:$0xff] %v3429_v18  ;;  %v3491_v18 = vld [vmem:[%s3169_s19 + $0xb4] sm:$0xf0] }
  0x32   : > { %v783_v62 = vsel %vm759_vm0, %v778_v29, %v782_v46  ;;  %v322_v29 = vld [vmem:[%s3169_s19 + $0x8c] sm:$0x1]  ;;  %4517 = vst [vmem:[#allocation36_spill] sm:$0xff] %v3491_v18  ;;  %v1141_v18 = vshrl.u32 %v3247_v19, 16 }
  0x33   : > { %595 = vrot.lane.b32.xlu2 %v3241_v17, %s3117_s20  ;;  %593 = vrot.lane.b32.xlu1 %v3262_v22, %s3117_s20 }
  0x34   : > { %591 = vrot.lane.b32.xlu0 %v3250_v20, %s3117_s20 }
  0x3b   : > { %681 = vrot.lane.b32.xlu2 %v3265_v23, %s3118_s21  ;;  %679 = vrot.lane.b32.xlu1 %v3178_v2, %s3118_s21 }
  0x3c   : > { %597 = vrot.lane.b32.xlu0 %v3283_v27, %s3117_s20 }
  0x43   : > { %687 = vrot.lane.b32.xlu2 %v3172_v0, %s3118_s21  ;;  %685 = vrot.lane.b32.xlu1 %v3277_v25, %s3118_s21  ;;  %v792_v25 = vshll.u32 %v3380_v63, 16  ;;  %v797_v0 = vshrl.u32 %v3338_v41, 16  ;;  %v1073_v63 = vrot.slane %v1071_v52, 1  ;;  %v319_v52 = vld [vmem:[%s3169_s19 + $0x68] sm:$0x1] }
  0x44   : > { %683 = vrot.lane.b32.xlu0 %v3175_v1, %s3118_s21 }
  0x45   : > { %v794_v42 = vrot.slane %v792_v25, 1  ;;  %v802_v54 = vor.u32 %v801_v51, %v797_v0  ;;  %v3443_v61 = vor.u32 %v1073_v63, %v1069_v60  ;;  %v1121_v60 = vrot.slane %v1119_v40, 1 }
  0x47   : > { %v795_v51 = vsel %vm759_vm0, %v3419_v11, %v794_v42  ;;  %v807_v0 = vsel %vm759_vm0, %v802_v54, %v806_v5  ;;  %4513 = vst [vmem:[#allocation32_spill] sm:$0xff] %v3443_v61  ;;  %v847_v54 = vshll.u32 %v3414_v55, 16  ;;  %v3480_v5 = vld [vmem:[%s3169_s19 + $0x9c] sm:$0xff]  }
  0x4b   : > { %693 = vrot.lane.b32.xlu2 %v3292_v28, %s3118_s21  ;;  %691 = vrot.lane.b32.xlu1 %v3223_v13, %s3118_s21  ;;  %v731_v28 = vunpack.c.l.b16 %v315_v48  ;;  %v1097_v48 = vrot.slane %v1095_v49, 1 }
  0x4c   : > { %689 = vrot.lane.b32.xlu0 %v3298_v30, %s3118_s21 }
  0x4d   : > { %v3424_v49 = vpack.c.b16 %v731_v28, %v731_v28  ;;  %v828_v28 = vshll.u32 %v3410_v6, 16  ;;  %v3435_v17 = vor.u32 %v1097_v48, %v1093_v37  ;;  %v3450_v37 = vld [vmem:[%s3169_s19 + $0x84] sm:$0xf0]  ;;  %v1117_v48 = vshrl.u32 %v3223_v13, 16 }
  0x4e   : > { %4514 = vst [vmem:[#allocation33_spill] sm:$0xff] %v3450_v37  ;;  %v842_v13 = vrot.slane %v840_v59, 1  ;;  %v3483_v37 = vld [vmem:[%s3169_s19 + $0x9c] sm:$0xf0] }
  0x4f   : > { %v816_v25 = vshll.u32 %v3424_v49, 16  ;;  %v3495_v24 = vor.u32 %v1121_v60, %v1117_v48  ;;  %v326_v48 = vld [vmem:[%s3169_s19 + $0xbc] sm:$0x1]  ;;  %v1143_v60 = vshll.u32 %v3247_v19, 16 }
  0x50   : > { %v742_v44 = vunpack.c.l.b16 %v326_v48 }
  0x51   : > { %v818_v63 = vrot.slane %v816_v25, 1  ;;  %4518 = vst [vmem:[#allocation37_spill] sm:$0xff] %v3495_v24 }
  0x53   : > { %699 = vrot.lane.b32.xlu2 %v3238_v16, %s3118_s21  ;;  %697 = vrot.lane.b32.xlu1 %v3310_v32, %s3118_s21 }
  0x54   : > { %695 = vrot.lane.b32.xlu0 %v3247_v19, %s3118_s21 }
  0x5b   : > { %705 = vrot.lane.b32.xlu2 %v3323_v35, %s3118_s21  ;;  %703 = vrot.lane.b32.xlu1 %v3262_v22, %s3118_s21 }
  0x5c   : > { %701 = vrot.lane.b32.xlu0 %v3332_v39, %s3118_s21  ;;  %v3402_v39 = vld [vmem:[%s3169_s19 + $0x6c] sm:$0xff]  }
  0x5d   : > { %v871_v46 = vshll.u32 %v3402_v39, 16  ;;  %v869_v59 = vshrl.u32 %v3402_v39, 16 }
  0x63   : > { %709 = vrot.lane.b32.xlu1 %v3362_v50, %s3118_s21  ;;  %952 = vrot.lane.b32.xlu2 %v771_v58, %s3119_s22  ;;  %v821_v50 = vshrl.u32 %v3370_v56, 16  ;;  %v735_v58 = vunpack.c.l.b16 %v319_v52 }
  0x64   : > { %707 = vrot.lane.b32.xlu0 %v3283_v27, %s3118_s21  ;;  %v736_v27 = vunpack.c.l.b16 %v320_v26  ;;  %v830_v26 = vrot.slane %v828_v28, 1  ;;  %v323_v28 = vld [vmem:[%s3169_s19 + $0x98] sm:$0x1] }
  0x65   : > { %v826_v52 = vor.u32 %v825_v15, %v821_v50  ;;  %v3453_v42 = vpack.c.b16 %v735_v58, %v735_v58  ;;  %v3462_v50 = vpack.c.b16 %v734_v34, %v734_v34  ;;  %v1167_v58 = vshll.u32 %v3238_v16, 16 }
  0x66   : > { %v3458_v31 = vpack.c.b16 %v736_v27, %v736_v27 }
  0x67   : > { %4515 = vst [vmem:[#allocation34_spill] sm:$0xff] %v3462_v50  ;;  %v831_v27 = vsel %vm759_vm0, %v826_v52, %v830_v26  ;;  %v864_v40 = vshll.u32 %v3453_v42, 16  ;;  %v738_v52 = vunpack.c.l.b16 %v322_v29  ;;  %v739_v26 = vunpack.c.l.b16 %v323_v28  ;;  %v325_v28 = vld [vmem:[%s3169_s19 + $0xb0] sm:$0x1] }
  0x68   : > { %v876_v34 = vshll.u32 %v3458_v31, 16 }
  0x69   : > { %v866_v6 = vrot.slane %v864_v40, 1 }
  0x6a   : > { %v878_v29 = vrot.slane %v876_v34, 1  ;;  %v1169_v34 = vrot.slane %v1167_v58, 1 }
  0x6b   : > { %956 = vrot.lane.b32.xlu1 %v795_v51, %s3119_s22  ;;  %958 = vrot.lane.b32.xlu2 %v807_v0, %s3119_s22  ;;  %v321_v51 = vld [vmem:[%s3169_s19 + $0x80] sm:$0x1]  ;;  %v819_v0 = vsel %vm759_vm0, %v3443_v61, %v818_v63  ;;  %v845_v63 = vshrl.u32 %v3414_v55, 16  ;;  %v852_v61 = vshll.u32 %v3462_v50, 16  ;;  %v895_v50 = vshll.u32 %v3447_v47, 16 }
  0x6c   : > { %954 = vrot.lane.b32.xlu0 %v783_v62, %s3119_s22  ;;  %v873_v62 = vrot.slane %v871_v46, 1  ;;  %v849_v46 = vrot.slane %v847_v54, 1  ;;  %v737_v14 = vunpack.c.l.b16 %v321_v51  ;;  %v3503_v54 = vpack.c.b16 %v738_v52, %v738_v52 }
  0x6d   : > { %v578_v15 = vpop.permute.xlu2 %577  ;;  %v3506_v51 = vpack.c.b16 %v739_v26, %v739_v26  ;;  %v893_v26 = vshrl.u32 %v3447_v47, 16  ;;  %v897_v30 = vrot.slane %v895_v50, 1  ;;  %v3530_v50 = vpack.c.b16 %v742_v44, %v742_v44 }
  0x6e   : > { %v3470_v25 = vsel %vm1913_vm1, %v3370_v56, %v578_v15  ;;  %v843_v56 = vsel %vm759_vm0, %v3435_v17, %v842_v13  ;;  %v3488_v15 = vld [vmem:[%s3169_s19 + $0xb4] sm:$0xff]   ;;  %v874_v13 = vor.u32 %v873_v62, %v869_v59  ;;  %4519 = vst [vmem:[#allocation38_spill] sm:$0xff] %v3503_v54  ;;  %v850_v40 = vor.u32 %v849_v46, %v845_v63 }
  0x6f   : > { %4516 = vst [vmem:[#allocation35_spill] sm:$0xff] %v3488_v15  ;;  %v854_v59 = vrot.slane %v852_v61, 1  ;;  %v3512_v62 = vpack.c.b16 %v737_v14, %v737_v14  ;;  %v900_v23 = vshll.u32 %v3503_v54, 16  ;;  %v912_v36 = vshll.u32 %v3506_v51, 16  ;;  %v2606_v54 = vld [vmem:[%s3169_s19 + $0xa4] sm:$0x1] }
  0x70   : > { %v879_v52 = vsel %vm759_vm0, %v874_v13, %v878_v29  ;;  %v1145_v63 = vrot.slane %v1143_v60, 1  ;;  %v1191_v14 = vshll.u32 %v3262_v22, 16  ;;  %v919_v46 = vshll.u32 %v3480_v5, 16 }
  0x71   : > { %4520 = vst [vmem:[#allocation39_spill] sm:$0xff] %v3512_v62  ;;  %v855_v61 = vsel %vm759_vm0, %v850_v40, %v854_v59  ;;  %v888_v53 = vshll.u32 %v3512_v62, 16  ;;  %v943_v13 = vshll.u32 %v3488_v15, 16  ;;  %v4522_v29 = vshrl.u32 %v3238_v16, 16  ;;  %v2602_v40 = vld [vmem:[%s3169_s19 + $0x74] sm:$0x1] }
  0x72   : > { %v902_v48 = vrot.slane %v900_v23, 1  ;;  %v914_v60 = vrot.slane %v912_v36, 1  ;;  %v3539_v59 = vor.u32 %v1145_v63, %v1141_v18  ;;  %v941_v23 = vshrl.u32 %v3488_v15, 16 }
  0x73   : > { %962 = vrot.lane.b32.xlu1 %v831_v27, %s3119_s22  ;;  %964 = vrot.lane.b32.xlu2 %v843_v56, %s3119_s22  ;;  %v741_v56 = vunpack.c.l.b16 %v325_v28  ;;  %v3535_v28 = vor.u32 %v1169_v34, %v4522_v29  ;;  %v917_v34 = vshrl.u32 %v3480_v5, 16  ;;  %v921_v29 = vrot.slane %v919_v46, 1 }
  0x74   : > { %960 = vrot.lane.b32.xlu0 %v819_v0, %s3119_s22  ;;  %v867_v0 = vsel %vm759_vm0, %v3495_v24, %v866_v6  ;;  %v3525_v6 = vpack.c.b16 %v740_v57, %v740_v57  ;;  %v898_v57 = vor.u32 %v897_v30, %v893_v26  ;;  %v2594_v30 = vld [vmem:[%s3169_s19 + $0x14] sm:$0x1]  ;;  %v945_v36 = vrot.slane %v943_v13, 1 }
  0x75   : > { %v3510_v27 = vpop.permute.xlu2 %575  ;;  %v3523_v58 = vpack.c.b16 %v741_v56, %v741_v56  ;;  %v1189_v56 = vshrl.u32 %v3262_v22, 16  ;;  %v948_v18 = vshll.u32 %v3530_v50, 16  ;;  %v1008_v26 = vunpack.c.l.b16 %v2602_v40 }
  0x76   : > { %v903_v22 = vsel %vm759_vm0, %v898_v57, %v902_v48  ;;  %v915_v63 = vsel %vm759_vm0, %v3535_v28, %v914_v60  ;;  %v1000_v24 = vunpack.c.l.b16 %v2594_v30  ;;  %v922_v62 = vor.u32 %v921_v29, %v917_v34  ;;  %v2622_v34 = vld [vmem:[%s3169_s19 + $0xb0] sm:$0x1] }
  0x77   : > { %4521 = vst [vmem:[#allocation40_spill] sm:$0xff] %v3523_v58  ;;  %v936_v16 = vshll.u32 %v3523_v58, 16  ;;  %v1131_v13 = vshll.u32 %v3205_v9, 16  ;;  %v946_v57 = vor.u32 %v945_v36, %v941_v23  ;;  %v950_v48 = vrot.slane %v948_v18, 1  ;;  %v2618_v18 = vld [vmem:[%s3169_s19 + $0x80] sm:$0x1] }
  0x78   : > { %v1179_v60 = vshll.u32 %v3250_v20, 16 }
  0x79   : > { %v938_v58 = vrot.slane %v936_v16, 1  ;;  %v3568_v16 = vpack.c.b16 %v1000_v24, %v1000_v24  ;;  %v1129_v24 = vshrl.u32 %v3205_v9, 16 }
  0x7b   : > { %968 = vrot.lane.b32.xlu1 %v867_v0, %s3119_s22  ;;  %970 = vrot.lane.b32.xlu2 %v879_v52, %s3119_s22  ;;  %v1193_v0 = vrot.slane %v1191_v14, 1  ;;  %v890_v52 = vrot.slane %v888_v53, 1  ;;  %v1012_v14 = vunpack.c.l.b16 %v2606_v54  ;;  %v3561_v54 = vpack.c.b16 %v1008_v26, %v1008_v26 }
  0x7c   : > { %966 = vrot.lane.b32.xlu0 %v855_v61, %s3119_s22  ;;  %v924_v61 = vshll.u32 %v3525_v6, 16  ;;  %v951_v26 = vsel %vm759_vm0, %v946_v57, %v950_v48 }
  0x7d   : > { %v3542_v44 = vpop.permute.xlu2 %583  ;;  %v891_v53 = vsel %vm759_vm0, %v3539_v59, %v890_v52  ;;  %v3556_v46 = vor.u32 %v1193_v0, %v1189_v56  ;;  %v3565_v40 = vpack.c.b16 %v1012_v14, %v1012_v14  ;;  %v1035_v56 = vshll.u32 %v3199_v7, 16 }
  0x7e   : > { %v926_v15 = vrot.slane %v924_v61, 1  ;;  %v1181_v14 = vrot.slane %v1179_v60, 1 }
  0x7f   : > { %v939_v23 = vsel %vm759_vm0, %v3556_v46, %v938_v58 }
  0x80   : > { %v927_v36 = vsel %vm759_vm0, %v922_v62, %v926_v15  ;;  %v1040_v15 = vshll.u32 %v3568_v16, 16  ;;  %v1280_v62 = vunpack.c.l.b16 %v2618_v18  ;;  %v2899_v18 = vld [vmem:[%s3169_s19 + $0x60] sm:$0xe] }
  0x83   : > { %974 = vrot.lane.b32.xlu1 %v903_v22, %s3119_s22  ;;  %976 = vrot.lane.b32.xlu2 %v915_v63, %s3119_s22  ;;  %v1133_v22 = vrot.slane %v1131_v13, 1  ;;  %v1136_v63 = vshll.u32 %v3561_v54, 16 }
  0x84   : > { %972 = vrot.lane.b32.xlu0 %v891_v53, %s3119_s22  ;;  %v1284_v53 = vunpack.c.l.b16 %v2622_v34  ;;  %v3599_v34 = vpack.c.b16 %v1280_v62, %v1280_v62 }
  0x85   : > { %v590_v0 = vpop.permute.xlu2 %589  ;;  %v574_v52 = vpop.permute.xlu1 %573  ;;  %v1134_v9 = vor.u32 %v1133_v22, %v1129_v24 }
  0x86   : > { %v3573_v29 = vsel %vm1913_vm1, %v3447_v47, %v590_v0  ;;  %v3577_v61 = vsel %vm1913_vm1, %v3338_v41, %v574_v52  ;;  %v570_v30 = vpop.permute.xlu0 %569  ;;  %v1177_v47 = vshrl.u32 %v3250_v20, 16  ;;  %v1184_v41 = vshll.u32 %v3565_v40, 16 }
  0x87   : > { %v1033_v0 = vshrl.u32 %v3199_v7, 16  ;;  %v1037_v52 = vrot.slane %v1035_v56, 1  ;;  %v1138_v20 = vrot.slane %v1136_v63, 1  ;;  %v3593_v57 = vpack.c.b16 %v1284_v53, %v1284_v53 }
  0x88   : > { %v1182_v58 = vor.u32 %v1181_v14, %v1177_v47  ;;  %v1186_v13 = vrot.slane %v1184_v41, 1  ;;  %v1042_v56 = vrot.slane %v1040_v15, 1  ;;  %v3022_v47 = vld [vmem:[%s3169_s19 + $0x6c] sm:$0xe]  ;;  %v3025_v14 = vld [vmem:[%s3169_s19 + $0x9c] sm:$0xe]  ;;  %v1917_v62 = vsel %vm1913_vm1, %v3344_v43, %v570_v30 }
  0x89   : > { %v1038_v60 = vor.u32 %v1037_v52, %v1033_v0  ;;  %v1456_v22 = vshll.u32 %v3593_v57, 16  ;;  %v1408_v53 = vshll.u32 %v3599_v34, 16  ;;  %v1602_v15 = vrot.slane %v3453_v42, 1 }
  0x8a   : > { %v1187_v24 = vsel %vm759_vm0, %v1182_v58, %v1186_v13  ;;  %v2598_v13 = vld [vmem:[%s3169_s19 + $0x44] sm:$0x1]  ;;  %v3023_v42 = vor.u32 %v3022_v47, %v3208_v10  ;;  %v1742_v47 = vrot.slane %v3565_v40, 1 }
  0x8b   : > { %980 = vrot.lane.b32.xlu1 %v939_v23, %s3119_s22  ;;  %982 = vrot.lane.b32.xlu2 %v951_v26, %s3119_s22  ;;  %v2898_v23 = vld [vmem:[%s3169_s19 + $0x60] sm:$0xf0]  ;;  %v1043_v41 = vsel %vm759_vm0, %v1038_v60, %v1042_v56  ;;  %v1458_v0 = vrot.slane %v1456_v22, 1  ;;  %v1410_v58 = vrot.slane %v1408_v53, 1  ;;  %v1004_v22 = vunpack.c.l.b16 %v2598_v13 }
  0x8c   : > { %978 = vrot.lane.b32.xlu0 %v927_v36, %s3119_s22  ;;  %v1139_v36 = vsel %vm759_vm0, %v1134_v9, %v1138_v20  ;;  %v2900_v63 = vor.u32 %v2899_v18, %v2898_v23  ;;  %v2904_v18 = vld [vmem:[%s3169_s19 + $0x90] sm:$0xf0]  ;;  %v1729_v10 = vrot.slane %v3023_v42, 1  ;;  %v2610_v42 = vld [vmem:[%s3169_s19 + $0x20] sm:$0x1] }
  0x8d   : > { %v3595_v7 = vpop.permute.xlu2 %595  ;;  %v3597_v48 = vpop.permute.xlu1 %571  ;;  %v1459_v43 = vsel %vm759_vm0, %v3556_v46, %v1458_v0  ;;  %v3641_v53 = vpack.c.b16 %v1004_v22, %v1004_v22  ;;  %v2614_v0 = vld [vmem:[%s3169_s19 + $0x50] sm:$0x1] }
  0x8e   : > { %v3603_v26 = vpop.permute.xlu0 %567  ;;  %v1601_v52 = vrot.slane %v2900_v63, 1  ;;  %v1411_v63 = vsel %vm759_vm0, %v3539_v59, %v1410_v58  ;;  %v2953_v58 = vld [vmem:[%s3169_s19 + $0xa8] sm:$0xe] }
  0x90   : > { %v1603_v30 = vsel %vm1576_vm3, %v1601_v52, %v1602_v15  ;;  %v1923_v52 = vsel %vm1913_vm1, %v3175_v1, %v3510_v27  ;;  %v1276_v1 = vunpack.c.l.b16 %v2614_v0 }
  0x93   : > { %1240 = vrot.lane.b32.xlu1 %v1139_v36, %s3120_s23  ;;  %1248 = vrot.lane.b32.xlu2 %v1187_v24, %s3120_s23  ;;  %v2905_v36 = vld [vmem:[%s3169_s19 + $0x90] sm:$0xe]  ;;  %v3026_v24 = vor.u32 %v3025_v14, %v3253_v21  ;;  %v1730_v21 = vrot.slane %v3561_v54, 1  ;;  %v1083_v14 = vshll.u32 %v3185_v3, 16 }
  0x94   : > { %1224 = vrot.lane.b32.xlu0 %v1043_v41, %s3120_s23  ;;  %v2906_v41 = vor.u32 %v2905_v36, %v2904_v18  ;;  %v2946_v18 = vld [vmem:[%s3169_s19 + $0x78] sm:$0xf0]  ;;  %v2947_v36 = vld [vmem:[%s3169_s19 + $0x78] sm:$0xe] }
  0x95   : > { %v682_v9 = vpop.permute.xlu2 %681  ;;  %v582_v20 = vpop.permute.xlu1 %581  ;;  %v1085_v22 = vrot.slane %v1083_v14, 1 }
  0x96   : > { %v3620_v60 = vsel %vm1946_vm2, %v1917_v62, %v682_v9  ;;  %v1929_v56 = vsel %vm1913_vm1, %v3414_v55, %v582_v20  ;;  %v3624_v23 = vpop.permute.xlu0 %579  ;;  %v1741_v55 = vrot.slane %v3026_v24, 1  ;;  %v1613_v54 = vrot.slane %v2906_v41, 1  ;;  %v2952_v20 = vld [vmem:[%s3169_s19 + $0xa8] sm:$0xf0] }
  0x97   : > { %v1614_v9 = vrot.slane %v3506_v51, 1  ;;  %v1731_v24 = vsel %vm1576_vm3, %v1729_v10, %v1730_v21  ;;  %v2954_v27 = vor.u32 %v2953_v58, %v2952_v20  ;;  %v1088_v51 = vshll.u32 %v3641_v53, 16  ;;  %v2886_v20 = vld [vmem:[%s3169_s19] sm:$0xf0]  ;;  %v2887_v58 = vld [vmem:[%s3169_s19] sm:$0xe] }
  0x98   : > { %v2948_v41 = vor.u32 %v2947_v36, %v2946_v18  ;;  %v3665_v10 = vpack.c.b16 %v1276_v1, %v1276_v1 }
  0x99   : > { %v1869_v21 = vrot.slane %v2954_v27, 1 }
  0x9b   : > { %1520 = vrot.lane.b32.xlu1 %v1459_v43, %s3121_s24  ;;  %1641 = vrot.lane.b32.xlu2 %v1603_v30, %s3122_s25  ;;  %v1743_v43 = vsel %vm1576_vm3, %v1741_v55, %v1742_v47  ;;  %v1081_v30 = vshrl.u32 %v3185_v3, 16  ;;  %v1870_v3 = vrot.slane %v3593_v57, 1  ;;  %v1090_v47 = vrot.slane %v1088_v51, 1 }
  0x9c   : > { %1512 = vrot.lane.b32.xlu0 %v1411_v63, %s3121_s24  ;;  %v1615_v63 = vsel %vm1576_vm3, %v1613_v54, %v1614_v9  ;;  %v1858_v54 = vrot.slane %v3599_v34, 1  ;;  %v2888_v34 = vor.u32 %v2887_v58, %v2886_v20  ;;  %v1578_v51 = vrot.slane %v3353_v45, 1 }
  0x9d   : > { %v688_v15 = vpop.permute.xlu2 %687  ;;  %v588_v62 = vpop.permute.xlu1 %587  ;;  %v1086_v55 = vor.u32 %v1085_v22, %v1081_v30  ;;  %v3028_v30 = vld [vmem:[%s3169_s19 + $0xc] sm:$0xe] }
  0x9e   : > { %v3651_v40 = vsel %vm1946_vm2, %v1923_v52, %v688_v15  ;;  %v3653_v13 = vpop.permute.xlu0 %585  ;;  %v1272_v52 = vunpack.c.l.b16 %v2610_v42  ;;  %v1857_v15 = vrot.slane %v2948_v41, 1  ;;  %v1360_v42 = vshll.u32 %v3665_v10, 16 }
  0x9f   : > { %v1577_v22 = vrot.slane %v2888_v34, 1  ;;  %v1915_v41 = vsel %vm1913_vm1, %v3329_v38, %v3603_v26  ;;  %v3029_v26 = vor.u32 %v3028_v30, %v3202_v8 }
  0xa0   : > { %v3670_v9 = vpack.c.b16 %v1272_v52, %v1272_v52  ;;  %v1859_v1 = vsel %vm1576_vm3, %v1857_v15, %v1858_v54  ;;  %v1935_v52 = vsel %vm1913_vm1, %v3247_v19, %v588_v62  ;;  %v2893_v15 = vld [vmem:[%s3169_s19 + $0x30] sm:$0xe] }
  0xa1   : > { %v1579_v19 = vsel %vm1576_vm3, %v1577_v22, %v1578_v51  ;;  %v1705_v8 = vrot.slane %v3029_v26, 1  ;;  %v2619_v22 = vld [vmem:[%s3169_s19 + $0x8c] sm:$0x1]  ;;  %v2623_v51 = vld [vmem:[%s3169_s19 + $0xbc] sm:$0x1]  ;;  %v1846_v26 = vrot.slane %v3665_v10, 1 }
  0xa2   : > { %v1312_v27 = vshll.u32 %v3670_v9, 16 }
  0xa3   : > { %1769 = vrot.lane.b32.xlu1 %v1731_v24, %s3123_s26  ;;  %1777 = vrot.lane.b32.xlu2 %v1743_v43, %s3123_s26  ;;  %v1871_v24 = vsel %vm1576_vm3, %v1869_v21, %v1870_v3  ;;  %v1091_v43 = vsel %vm759_vm0, %v1086_v55, %v1090_v47 }
  0xa4   : > { %1649 = vrot.lane.b32.xlu0 %v1615_v63, %s3122_s25  ;;  %v2603_v63 = vld [vmem:[%s3169_s19 + $0x80] sm:$0x1]  ;;  %v1314_v55 = vrot.slane %v1312_v27, 1 }
  0xa5   : > { %v694_v14 = vpop.permute.xlu2 %693  ;;  %v594_v0 = vpop.permute.xlu1 %593  ;;  %v1009_v54 = vunpack.c.l.b16 %v2603_v63  ;;  %v1919_v63 = vsel %vm1913_vm1, %v3178_v2, %v3597_v48  ;;  %v1281_v48 = vunpack.c.l.b16 %v2619_v22 }
  0xa6   : > { %v3675_v18 = vsel %vm1946_vm2, %v1929_v56, %v694_v14  ;;  %v1941_v36 = vsel %vm1913_vm1, %v3480_v5, %v594_v0  ;;  %v3679_v57 = vpop.permute.xlu0 %591  ;;  %v3031_v56 = vld [vmem:[%s3169_s19 + $0x3c] sm:$0xe]  ;;  %v1362_v5 = vrot.slane %v1360_v42, 1  ;;  %v2892_v0 = vld [vmem:[%s3169_s19 + $0x30] sm:$0xf0]  ;;  %v1315_v20 = vsel %vm759_vm0, %v3419_v11, %v1314_v55 }
  0xa7   : > { %v3032_v62 = vor.u32 %v3031_v56, %v3188_v4  ;;  %v2894_v58 = vor.u32 %v2893_v15, %v2892_v0  ;;  %v2940_v42 = vld [vmem:[%s3169_s19 + $0x48] sm:$0xf0]  ;;  %v1706_v4 = vrot.slane %v3568_v16, 1  ;;  %v2607_v55 = vld [vmem:[%s3169_s19 + $0xb0] sm:$0x1] }
  0xa8   : > { %v1363_v38 = vsel %vm759_vm0, %v3435_v17, %v1362_v5  ;;  %v1590_v5 = vrot.slane %v3424_v49, 1 }
  0xa9   : > { %v1717_v34 = vrot.slane %v3032_v62, 1  ;;  %v1589_v56 = vrot.slane %v2894_v58, 1  ;;  %v1707_v15 = vsel %vm1576_vm3, %v1705_v8, %v1706_v4  ;;  %v1415_v62 = vshll.u32 %v3310_v32, 16  ;;  %v3016_v8 = vld [vmem:[%s3169_s19 + $0x48] sm:$0xff]  }
  0xaa   : > { %v1463_v58 = vshll.u32 %v3323_v35, 16  ;;  %v1927_v10 = vsel %vm1913_vm1, %v3016_v8, %v3624_v23 }
  0xab   : > { %1905 = vrot.lane.b32.xlu1 %v1871_v24, %s3124_s27  ;;  %1232 = vrot.lane.b32.xlu2 %v1091_v43, %s3120_s23  ;;  %v2941_v24 = vld [vmem:[%s3169_s19 + $0x48] sm:$0xe]  ;;  %v3719_v43 = vpack.c.b16 %v1009_v54, %v1009_v54 }
  0xac   : > { %1897 = vrot.lane.b32.xlu0 %v1859_v1, %s3124_s27  ;;  %v1718_v1 = vrot.slane %v3641_v53, 1  ;;  %v2942_v53 = vor.u32 %v2941_v24, %v2940_v42  ;;  %v3753_v42 = vpack.c.b16 %v1281_v48, %v1281_v48  ;;  %v1933_v48 = vsel %vm1913_vm1, %v3402_v39, %v3653_v13 }
  0xad   : > { %v700_v21 = vpop.permute.xlu2 %699  ;;  %v680_v3 = vpop.permute.xlu1 %679  ;;  %v1148_v0 = vshll.u32 %v3719_v43, 16 }
  0xae   : > { %v3699_v47 = vsel %vm1946_vm2, %v1935_v52, %v700_v21  ;;  %v3702_v14 = vsel %vm1946_vm2, %v1915_v41, %v680_v3  ;;  %v3704_v45 = vpop.permute.xlu0 %597  ;;  %v2934_v21 = vld [vmem:[%s3169_s19 + $0x18] sm:$0xf0]  ;;  %v2935_v3 = vld [vmem:[%s3169_s19 + $0x18] sm:$0xe]  ;;  %v1719_v2 = vsel %vm1576_vm3, %v1717_v34, %v1718_v1 }
  0xaf   : > { %v2936_v54 = vor.u32 %v2935_v3, %v2934_v21  ;;  %v1461_v21 = vshrl.u32 %v3323_v35, 16  ;;  %v1465_v3 = vrot.slane %v1463_v58, 1 }
  0xb1   : > { %v1833_v1 = vrot.slane %v2936_v54, 1 }
  0xb3   : > { %1504 = vrot.lane.b32.xlu1 %v1363_v38, %s3121_s24  ;;  %1625 = vrot.lane.b32.xlu2 %v1579_v19, %s3122_s25  ;;  %v1013_v38 = vunpack.c.l.b16 %v2607_v55  ;;  %v1845_v19 = vrot.slane %v2942_v53, 1  ;;  %v1420_v53 = vshll.u32 %v3753_v42, 16 }
  0xb4   : > { %1496 = vrot.lane.b32.xlu0 %v1315_v20, %s3121_s24  ;;  %v1150_v20 = vrot.slane %v1148_v0, 1  ;;  %v3034_v0 = vld [vmem:[%s3169_s19 + $0x9c] sm:$0xe] }
  0xb5   : > { %v706_v27 = vpop.permute.xlu2 %705  ;;  %v686_v30 = vpop.permute.xlu1 %685  ;;  %v1422_v35 = vrot.slane %v1420_v53, 1 }
  0xb6   : > { %v3731_v41 = vsel %vm1946_vm2, %v1941_v36, %v706_v27  ;;  %v3735_v16 = vsel %vm1946_vm2, %v3577_v61, %v686_v30  ;;  %v684_v52 = vpop.permute.xlu0 %683  ;;  %v1285_v36 = vunpack.c.l.b16 %v2623_v51  ;;  %v1591_v61 = vsel %vm1576_vm3, %v1589_v56, %v1590_v5 }
  0xb7   : > { %v3741_v49 = vsel %vm1946_vm2, %v1919_v63, %v684_v52  ;;  %v1834_v27 = vrot.slane %v3670_v9, 1  ;;  %v3761_v30 = vpack.c.b16 %v1013_v38, %v1013_v38  ;;  %v1847_v51 = vsel %vm1576_vm3, %v1845_v19, %v1846_v26  ;;  %v2922_v38 = vld [vmem:[%s3169_s19 + $0x78] sm:$0xf0]  ;;  %v2923_v19 = vld [vmem:[%s3169_s19 + $0x78] sm:$0xe]  ;;  %v3017_v26 = vld [vmem:[%s3169_s19 + $0x60] sm:$0xff]  }
  0xb8   : > { %v3755_v24 = vpack.c.b16 %v1285_v36, %v1285_v36  ;;  %v1151_v9 = vsel %vm759_vm0, %v3539_v59, %v1150_v20  ;;  %v1413_v63 = vshrl.u32 %v3310_v32, 16  ;;  %v1417_v52 = vrot.slane %v1415_v62, 1 }
  0xb9   : > { %v1835_v55 = vsel %vm1576_vm3, %v1833_v1, %v1834_v27  ;;  %v1466_v59 = vor.u32 %v1465_v3, %v1461_v21  ;;  %v1931_v62 = vsel %vm1913_vm1, %v3017_v26, %v3542_v44  ;;  %v2924_v44 = vor.u32 %v2923_v19, %v2922_v38  ;;  %v4524_v19 = vld [vmem:[#allocation10_spill] sm:$0xff] }
  0xba   : > { %v1418_v32 = vor.u32 %v1417_v52, %v1413_v63  ;;  %v3018_v63 = vld [vmem:[%s3169_s19 + $0x90] sm:$0xff]   ;;  %v1605_v3 = vrot.slane %v3458_v31, 1  ;;  %v1319_v26 = vshll.u32 %v4524_v19, 16 }
  0xbb   : > { %1753 = vrot.lane.b32.xlu1 %v1707_v15, %s3123_s26  ;;  %1761 = vrot.lane.b32.xlu2 %v1719_v2, %s3123_s26  ;;  %v3037_v15 = vld [vmem:[%s3169_s19 + $0x6c] sm:$0xe] }
  0xbc   : > { %1633 = vrot.lane.b32.xlu0 %v1591_v61, %s3122_s25  ;;  %v1423_v13 = vsel %vm759_vm0, %v1418_v32, %v1422_v35  ;;  %v3038_v27 = vor.u32 %v3037_v15, %v3405_v12  ;;  %v1939_v12 = vsel %vm1913_vm1, %v3018_v63, %v3679_v57  ;;  %v2595_v15 = vld [vmem:[%s3169_s19 + $0x20] sm:$0x1] }
  0xbd   : > { %v692_v4 = vpop.permute.xlu1 %691  ;;  %v953_v34 = vpop.permute.xlu2 %952 }
  0xbe   : > { %v1960_v56 = vsel %vm1946_vm2, %v1927_v10, %v692_v4  ;;  %v690_v5 = vpop.permute.xlu0 %689  ;;  %v3766_v22 = vsel %vm1979_vm4, %v3702_v14, %v953_v34  ;;  %v1468_v14 = vshll.u32 %v3755_v24, 16  ;;  %v3035_v4 = vor.u32 %v3034_v0, %v3483_v37  ;;  %v3040_v34 = vld [vmem:[%s3169_s19 + $0x84] sm:$0xe]  ;;  %v2928_v0 = vld [vmem:[%s3169_s19 + $0xa8] sm:$0xf0] }
  0xbf   : > { %v3771_v23 = vsel %vm1946_vm2, %v3470_v25, %v690_v5  ;;  %v1196_v25 = vshll.u32 %v3761_v30, 16  ;;  %v1617_v5 = vrot.slane %v3525_v6, 1  ;;  %v1604_v21 = vrot.slane %v3038_v27, 1  ;;  %v2611_v6 = vld [vmem:[%s3169_s19 + $0x2c] sm:$0x1] }
  0xc0   : > { %v1470_v2 = vrot.slane %v1468_v14, 1  ;;  %v1616_v37 = vrot.slane %v3035_v4, 1  ;;  %v3041_v57 = vor.u32 %v3040_v34, %v3313_v33  ;;  %v1861_v33 = vrot.slane %v3753_v42, 1 }
  0xc1   : > { %v1198_v54 = vrot.slane %v1196_v25, 1  ;;  %v1745_v42 = vrot.slane %v3761_v30, 1 }
  0xc2   : > { %v1471_v10 = vsel %vm759_vm0, %v1466_v59, %v1470_v2  ;;  %v1618_v31 = vsel %vm1576_vm3, %v1616_v37, %v1617_v5  ;;  %v4523_v2 = vld [vmem:[#allocation18_spill] sm:$0xff] }
  0xc3   : > { %1889 = vrot.lane.b32.xlu1 %v1847_v51, %s3124_s27  ;;  %1242 = vrot.lane.b32.xlu2 %v1151_v9, %s3120_s23  ;;  %v1199_v1 = vsel %vm759_vm0, %v3556_v46, %v1198_v54  ;;  %v1732_v51 = vrot.slane %v2924_v44, 1  ;;  %v1733_v9 = vrot.slane %v3719_v43, 1  ;;  %v2599_v46 = vld [vmem:[%s3169_s19 + $0x50] sm:$0x1]  ;;  %v2929_v43 = vld [vmem:[%s3169_s19 + $0xa8] sm:$0xe]  ;;  %v1001_v54 = vunpack.c.l.b16 %v2595_v15 }
  0xc4   : > { %1881 = vrot.lane.b32.xlu0 %v1835_v55, %s3124_s27  ;;  %v1005_v35 = vunpack.c.l.b16 %v2599_v46  ;;  %v4526_v15 = vld [vmem:[#allocation16_spill] sm:$0xff] }
  0xc5   : > { %v698_v36 = vpop.permute.xlu1 %697  ;;  %v959_v61 = vpop.permute.xlu2 %958  ;;  %v1734_v59 = vsel %vm1576_vm3, %v1732_v51, %v1733_v9  ;;  %v3855_v27 = vpack.c.b16 %v1001_v54, %v1001_v54 }
  0xc6   : > { %v3795_v20 = vsel %vm1946_vm2, %v1933_v48, %v698_v36  ;;  %v696_v58 = vpop.permute.xlu0 %695  ;;  %v3799_v8 = vsel %vm1979_vm4, %v3735_v16, %v959_v61  ;;  %v3043_v16 = vld [vmem:[%s3169_s19 + $0xb4] sm:$0xe]  ;;  %v1273_v36 = vunpack.c.l.b16 %v2611_v6  ;;  %v2930_v61 = vor.u32 %v2929_v43, %v2928_v0  ;;  %v3049_v6 = vld [vmem:[%s3169_s19 + $0x3c] sm:$0xe] }
  0xc7   : > { %v3802_v39 = vsel %vm1946_vm2, %v1931_v62, %v696_v58  ;;  %v3044_v48 = vor.u32 %v3043_v16, %v4523_v2  ;;  %v3844_v38 = vpack.c.b16 %v1005_v35, %v1005_v35  ;;  %v1873_v58 = vrot.slane %v3755_v24, 1  ;;  %v3019_v16 = vld [vmem:[%s3169_s19 + $0xa8] sm:$0xff]  }
  0xc8   : > { %v1943_v5 = vsel %vm1913_vm1, %v3019_v16, %v3595_v7  ;;  %v1317_v7 = vshrl.u32 %v4524_v19, 16 }
  0xc9   : > { %v1872_v62 = vrot.slane %v3044_v48, 1  ;;  %v1100_v46 = vshll.u32 %v3844_v38, 16 }
  0xcb   : > { %1514 = vrot.lane.b32.xlu1 %v1423_v13, %s3121_s24  ;;  %1522 = vrot.lane.b32.xlu2 %v1471_v10, %s3121_s24  ;;  %v3849_v13 = vpack.c.b16 %v1273_v36, %v1273_v36  ;;  %v4525_v10 = vld [vmem:[#allocation35_spill] sm:$0xff]  ;;  %v1874_v63 = vsel %vm1576_vm3, %v1872_v62, %v1873_v58  ;;  %v1365_v58 = vshrl.u32 %v4526_v15, 16 }
  0xcc   : > { %1250 = vrot.lane.b32.xlu0 %v1199_v1, %s3120_s23  ;;  %v1945_v4 = vsel %vm1913_vm1, %v4525_v10, %v3704_v45  ;;  %v1744_v1 = vrot.slane %v2930_v61, 1  ;;  %v2615_v45 = vld [vmem:[%s3169_s19 + $0x5c] sm:$0x1]  ;;  %v3052_v61 = vld [vmem:[%s3169_s19 + $0x24] sm:$0xe] }
  0xcd   : > { %v704_v52 = vpop.permute.xlu1 %703  ;;  %v965_v53 = vpop.permute.xlu2 %964 }
  0xce   : > { %v3824_v14 = vsel %vm1946_vm2, %v1939_v12, %v704_v52  ;;  %v702_v55 = vpop.permute.xlu0 %701  ;;  %v3827_v25 = vsel %vm1979_vm4, %v1960_v56, %v965_v53  ;;  %v1606_v56 = vsel %vm1576_vm3, %v1604_v21, %v1605_v3  ;;  %v1321_v12 = vrot.slane %v1319_v26, 1  ;;  %v3046_v21 = vld [vmem:[%s3169_s19 + $0xc] sm:$0xe]  ;;  %v4528_v26 = vld [vmem:[#allocation25_spill] sm:$0xff] }
  0xcf   : > { %v3834_v32 = vsel %vm1946_vm2, %v3573_v29, %v702_v55  ;;  %v1860_v29 = vrot.slane %v3041_v57, 1  ;;  %v1324_v52 = vshll.u32 %v3849_v13, 16  ;;  %v1746_v53 = vsel %vm1576_vm3, %v1744_v1, %v1745_v42  ;;  %v4530_v42 = vld [vmem:[#allocation29_spill] sm:$0xff] }
  0xd0   : > { %v1277_v3 = vunpack.c.l.b16 %v2615_v45  ;;  %v1102_v55 = vrot.slane %v1100_v46, 1  ;;  %v1322_v0 = vor.u32 %v1321_v12, %v1317_v7  ;;  %v1367_v57 = vshll.u32 %v4526_v15, 16 }
  0xd1   : > { %v1862_v30 = vsel %vm1576_vm3, %v1860_v29, %v1861_v33  ;;  %v1326_v43 = vrot.slane %v1324_v52, 1  ;;  %v4527_v33 = vld [vmem:[#allocation22_spill] sm:$0xff]  ;;  %v3050_v62 = vor.u32 %v3049_v6, %v4528_v26  ;;  %v1593_v16 = vrot.slane %v4530_v42, 1 }
  0xd2   : > { %v3884_v2 = vpack.c.b16 %v1277_v3, %v1277_v3  ;;  %v1103_v54 = vsel %vm759_vm0, %v3435_v17, %v1102_v55  ;;  %v3047_v19 = vor.u32 %v3046_v21, %v4527_v33  ;;  %v1369_v10 = vrot.slane %v1367_v57, 1  ;;  %v2916_v17 = vld [vmem:[%s3169_s19 + $0x48] sm:$0xf0]  ;;  %v2911_v21 = vld [vmem:[%s3169_s19 + $0x18] sm:$0xe] }
  0xd3   : > { %1651 = vrot.lane.b32.xlu1 %v1618_v31, %s3122_s25  ;;  %1771 = vrot.lane.b32.xlu2 %v1734_v59, %s3123_s26  ;;  %v1327_v29 = vsel %vm759_vm0, %v1322_v0, %v1326_v43  ;;  %v4531_v3 = vld [vmem:[#allocation11_spill] sm:$0xff] }
  0xd4   : > { %1643 = vrot.lane.b32.xlu0 %v1606_v56, %s3122_s25  ;;  %v3053_v6 = vor.u32 %v3052_v61, %v4531_v3  ;;  %v1837_v61 = vrot.slane %v3849_v13, 1 }
  0xd5   : > { %v710_v44 = vpop.permute.xlu1 %709  ;;  %v971_v34 = vpop.permute.xlu2 %970 }
  0xd6   : > { %v1978_v24 = vsel %vm1946_vm2, %v1945_v4, %v710_v44  ;;  %v708_v37 = vpop.permute.xlu0 %707  ;;  %v3863_v51 = vsel %vm1979_vm4, %v3795_v20, %v971_v34  ;;  %v1052_v20 = vshll.u32 %v3855_v27, 16  ;;  %v2917_v4 = vld [vmem:[%s3169_s19 + $0x48] sm:$0xe]  ;;  %v1580_v44 = vrot.slane %v3047_v19, 1  ;;  %v4529_v34 = vld [vmem:[#allocation28_spill] sm:$0xff] }
  0xd7   : > { %v3867_v9 = vsel %vm1946_vm2, %v1943_v5, %v708_v37  ;;  %v1581_v1 = vrot.slane %v4529_v34, 1  ;;  %v2604_v5 = vld [vmem:[%s3169_s19 + $0x8c] sm:$0x1]  ;;  %v4533_v19 = vld [vmem:[#allocation8_spill] sm:$0xff]  ;;  %v2620_v34 = vld [vmem:[%s3169_s19 + $0x98] sm:$0x1] }
  0xd8   : > { %v1054_v59 = vrot.slane %v1052_v20, 1  ;;  %v2910_v20 = vld [vmem:[%s3169_s19 + $0x18] sm:$0xf0]  ;;  %v1010_v0 = vunpack.c.l.b16 %v2604_v5  ;;  %v1203_v26 = vshll.u32 %v4533_v19, 16  ;;  %v1201_v5 = vshrl.u32 %v4533_v19, 16 }
  0xd9   : > { %v1582_v43 = vsel %vm1576_vm3, %v1580_v44, %v1581_v1  ;;  %v2912_v57 = vor.u32 %v2911_v21, %v2910_v20  ;;  %v3020_v20 = vld [vmem:[%s3169_s19 + $0xc0] sm:$0xff]  }
  0xda   : > { %v3936_v33 = vpack.c.b16 %v1010_v0, %v1010_v0  ;;  %v1215_v21 = vshll.u32 %v3020_v20, 16  ;;  %v1213_v19 = vshrl.u32 %v3020_v20, 16 }
  0xdb   : > { %1899 = vrot.lane.b32.xlu1 %v1862_v30, %s3124_s27  ;;  %1907 = vrot.lane.b32.xlu2 %v1874_v63, %s3124_s27  ;;  %v1370_v30 = vor.u32 %v1369_v10, %v1365_v58  ;;  %v2608_v63 = vld [vmem:[%s3169_s19 + $0xbc] sm:$0x1]  ;;  %v1708_v58 = vrot.slane %v2912_v57, 1  ;;  %v1709_v10 = vrot.slane %v3855_v27, 1  ;;  %v2181_v27 = vld [vmem:[%s4446_s1 + $0x10] sm:$0x3] }
  0xdc   : > { %1779 = vrot.lane.b32.xlu0 %v1746_v53, %s3123_s26  ;;  %v2918_v53 = vor.u32 %v2917_v4, %v2916_v17  ;;  %v1014_v15 = vunpack.c.l.b16 %v2608_v63  ;;  %v1160_v42 = vshll.u32 %v3936_v33, 16  ;;  %v4534_v63 = vld [vmem:[#allocation17_spill] sm:$0xff] }
  0xdd   : > { %v957_v35 = vpop.permute.xlu1 %956  ;;  %v3882_v31 = vpop.permute.xlu2 %976 }
  0xde   : > { %v3888_v48 = vsel %vm1979_vm4, %v3741_v49, %v957_v35  ;;  %v955_v36 = vpop.permute.xlu0 %954  ;;  %v1055_v49 = vsel %vm759_vm0, %v3419_v11, %v1054_v59  ;;  %v1592_v11 = vrot.slane %v3050_v62, 1  ;;  %v1720_v35 = vrot.slane %v2918_v53, 1 }
  0xdf   : > { %v3892_v56 = vsel %vm1979_vm4, %v3620_v60, %v955_v36  ;;  %v1372_v60 = vshll.u32 %v3884_v2, 16  ;;  %v1721_v59 = vrot.slane %v3844_v38, 1  ;;  %v1836_v36 = vrot.slane %v3053_v6, 1  ;;  %v2624_v38 = vld [vmem:[%s3169_s19 + $0xc8] sm:$0x1] }
  0xe0   : > { %v3940_v62 = vpack.c.b16 %v1014_v15, %v1014_v15  ;;  %v1162_v0 = vrot.slane %v1160_v42, 1  ;;  %v2685_v42 = vld [vmem:[%s4446_s1] sm:$0xff] }
  0xe1   : > { %v1374_v46 = vrot.slane %v1372_v60, 1  ;;  %v1722_v17 = vsel %vm1576_vm3, %v1720_v35, %v1721_v59  ;;  %v1838_v4 = vsel %vm1576_vm3, %v1836_v36, %v1837_v61  ;;  %v1849_v59 = vrot.slane %v3884_v2, 1  ;;  %v2901_v61 = vld [vmem:[%s3169_s19 + $0x78] sm:$0xf0] }
  0xe3   : > { %1234 = vrot.lane.b32.xlu1 %v1103_v54, %s3120_s23  ;;  %1498 = vrot.lane.b32.xlu2 %v1327_v29, %s3121_s24  ;;  %v3055_v54 = vld [vmem:[%s3169_s19 + $0x54] sm:$0xe]  ;;  %v4532_v29 = vld [vmem:[#allocation6_spill] sm:$0xff] }
  0xe4   : > { %1226 = vrot.lane.b32.xlu0 %v1055_v49, %s3120_s23  ;;  %v1153_v44 = vshrl.u32 %v4532_v29, 16 }
  0xe5   : > { %v963_v37 = vpop.permute.xlu1 %962  ;;  %v983_v45 = vpop.permute.xlu2 %982 }
  0xe6   : > { %v3915_v7 = vsel %vm1979_vm4, %v3771_v23, %v963_v37  ;;  %v961_v12 = vpop.permute.xlu0 %960  ;;  %v3918_v52 = vsel %vm1979_vm4, %v1978_v24, %v983_v45  ;;  %v1594_v23 = vsel %vm1576_vm3, %v1592_v11, %v1593_v16  ;;  %v1375_v24 = vsel %vm759_vm0, %v1370_v30, %v1374_v46 }
  0xe7   : > { %v3925_v55 = vsel %vm1979_vm4, %v3651_v40, %v961_v12  ;;  %v1155_v40 = vshll.u32 %v4532_v29, 16  ;;  %v1286_v16 = vunpack.c.l.b16 %v2624_v38  ;;  %v1205_v37 = vrot.slane %v1203_v26, 1 }
  0xe8   : > { %v1208_v45 = vshll.u32 %v3940_v62, 16  ;;  %v2194_v30 = vunpack.c.l.b16 %v2181_v27  ;;  %v1710_v46 = vsel %vm1576_vm3, %v1708_v58, %v1709_v10  ;;  %v3056_v12 = vor.u32 %v3055_v54, %v4534_v63  ;;  %v2902_v54 = vld [vmem:[%s3169_s19 + $0x78] sm:$0xe]  ;;  %v2686_v58 = vld [vmem:[%s4446_s1 + $0x8] sm:$0xff] }
  0xe9   : > { %v1157_v11 = vrot.slane %v1155_v40, 1  ;;  %v3967_v6 = vpack.c.b16 %v1286_v16, %v1286_v16  ;;  %v1217_v26 = vrot.slane %v1215_v21, 1  ;;  %v4535_v27 = vld [vmem:[#allocation39_spill] sm:$0xff] }
  0xea   : > { %v2197_v53 = vpack.c.b16 %v2194_v30, %v2194_v30  ;;  %v1848_v35 = vrot.slane %v3056_v12, 1 }
  0xeb   : > { %1627 = vrot.lane.b32.xlu1 %v1582_v43, %s3122_s25  ;;  %1635 = vrot.lane.b32.xlu2 %v1594_v23, %s3122_s25  ;;  %v1158_v3 = vor.u32 %v1157_v11, %v1153_v44  ;;  %v1206_v43 = vor.u32 %v1205_v37, %v1201_v5  ;;  %v1210_v23 = vrot.slane %v1208_v45, 1  ;;  %v1480_v38 = vshll.u32 %v3967_v6, 16  ;;  %v3058_v44 = vld [vmem:[%s3169_s19 + $0x84] sm:$0xe]  ;;  %v2596_v37 = vld [vmem:[%s3169_s19 + $0x2c] sm:$0x1] }
  0xec   : > { %1506 = vrot.lane.b32.xlu0 %v1375_v24, %s3121_s24  ;;  %v2235_v15 = vsel %vm2233_vm5, %v2197_v53, 0  ;;  %v1608_v5 = vrot.slane %v4535_v27, 1  ;;  %v2908_v53 = vld [vmem:[%s3169_s19 + $0xa8] sm:$0xe]  ;;  %v1002_v21 = vunpack.c.l.b16 %v2596_v37  ;;  %v2949_v27 = vld [vmem:[%s3169_s19 + $0x90] sm:$0xf0] }
  0xed   : > { %v3943_v49 = vpop.permute.xlu1 %968  ;;  %v3945_v13 = vpop.permute.xlu2 %1248  ;;  %2974 = vmatpush.bf16.msra.mxu2 %v2235_v15  ;;  %2975 = vmatpush.bf16.msra.mxu3 %v2235_v15  ;;  %v1163_v10 = vsel %vm759_vm0, %v1158_v3, %v1162_v0  ;;  %v1482_v11 = vrot.slane %v1480_v38, 1 }
  0xee   : > { %v967_v60 = vpop.permute.xlu0 %966  ;;  %2242 = vmatpush.bf16.msra.mxu0 %v2235_v15  ;;  %2973 = vmatpush.bf16.msra.mxu1 %v2235_v15 }
  0xef   : > { %v3954_v1 = vsel %vm1979_vm4, %v3675_v18, %v967_v60  ;;  %v1282_v18 = vunpack.c.l.b16 %v2620_v34  ;;  %v2903_v60 = vor.u32 %v2902_v54, %v2901_v61  ;;  %v3061_v34 = vld [vmem:[%s3169_s19 + $0xb4] sm:$0xe]  ;;  %v2956_v54 = vld [vmem:[%s3169_s19 + $0xc0] sm:$0xe] }
  0xf1   : > { %v3973_v36 = vpack.c.b16 %v1282_v18, %v1282_v18  ;;  %2977 = vmatpush.bf16.msra.mxu2 %v2686_v58  ;;  %2978 = vmatpush.bf16.msra.mxu3 %v2686_v58  ;;  %v1607_v16 = vrot.slane %v2903_v60, 1  ;;  %v2907_v18 = vld [vmem:[%s3169_s19 + $0xa8] sm:$0xf0] }
  0xf2   : > { %2243 = vmatpush.bf16.msra.mxu0 %v2686_v58  ;;  %2976 = vmatpush.bf16.msra.mxu1 %v2686_v58  ;;  %v1748_v58 = vrot.slane %v3940_v62, 1 }
  0xf3   : > { %1763 = vrot.lane.b32.xlu1 %v1722_v17, %s3123_s26  ;;  %1883 = vrot.lane.b32.xlu2 %v1838_v4, %s3124_s27  ;;  %v1850_v17 = vsel %vm1576_vm3, %v1848_v35, %v1849_v59  ;;  %v1432_v4 = vshll.u32 %v3973_v36, 16  ;;  %v1609_v0 = vsel %vm1576_vm3, %v1607_v16, %v1608_v5  ;;  %v2909_v35 = vor.u32 %v2908_v53, %v2907_v18  ;;  %v4538_v59 = vld [vmem:[#allocation2_spill] sm:$0xff]  ;;  %v2950_v5 = vld [vmem:[%s3169_s19 + $0x90] sm:$0xe] }
  0xf4   : > { %1755 = vrot.lane.b32.xlu0 %v1710_v46, %s3123_s26  ;;  %v1059_v61 = vshll.u32 %v4538_v59, 16 }
  0xf5   : > { %v975_v24 = vpop.permute.xlu1 %974  ;;  %v3970_v57 = vpop.permute.xlu2 %1641  ;;  %v1434_v46 = vrot.slane %v1432_v4, 1  ;;  %2980 = vmatpush.bf16.msra.mxu2 %v2685_v42  ;;  %2981 = vmatpush.bf16.msra.mxu3 %v2685_v42  ;;  %v4539_v4 = vld [vmem:[#allocation40_spill] sm:$0xff] }
  0xf6   : > { %v3979_v29 = vsel %vm1979_vm4, %v3834_v32, %v975_v24  ;;  %v973_v40 = vpop.permute.xlu0 %972  ;;  %v1211_v32 = vsel %vm759_vm0, %v1206_v43, %v1210_v23  ;;  %2244 = vmatpush.bf16.msra.mxu0 %v2685_v42  ;;  %2979 = vmatpush.bf16.msra.mxu1 %v2685_v42  ;;  %v4536_v43 = vld [vmem:[#allocation7_spill] sm:$0xff]  ;;  %v4537_v23 = vld [vmem:[#allocation9_spill] sm:$0xff]  ;;  %v1061_v37 = vrot.slane %v1059_v61, 1 }
  0xf7   : > { %v3983_v2 = vsel %vm1979_vm4, %v3699_v47, %v973_v40  ;;  %v3995_v47 = vor.u32 %v1217_v26, %v1213_v19  ;;  %v3062_v15 = vor.u32 %v3061_v34, %v4537_v23  ;;  %v1435_v24 = vsel %vm759_vm0, %v3535_v28, %v1434_v46  ;;  %v2600_v34 = vld [vmem:[%s3169_s19 + $0x5c] sm:$0x1] }
  0xf8   : > { %v4029_v40 = vpack.c.b16 %v1002_v21, %v1002_v21  ;;  %v1736_v26 = vrot.slane %v3936_v33, 1  ;;  %v1057_v33 = vshrl.u32 %v4538_v59, 16  ;;  %v1006_v18 = vunpack.c.l.b16 %v2600_v34 }
  0xf9   : > { %v1483_v3 = vsel %vm759_vm0, %v3995_v47, %v1482_v11  ;;  %v1747_v38 = vrot.slane %v3062_v15, 1  ;;  %v2616_v11 = vld [vmem:[%s3169_s19 + $0x68] sm:$0x1] }
  0xfa   : > { %v1064_v62 = vshll.u32 %v4029_v40, 16  ;;  %v1278_v53 = vunpack.c.l.b16 %v2616_v11  ;;  %v4058_v59 = vpack.c.b16 %v1006_v18, %v1006_v18  ;;  %v3064_v11 = vld [vmem:[%s3169_s19 + $0x24] sm:$0xe]  ;;  %v1997_v18 = vsel %vm1979_vm4, %v3802_v39, %v3943_v49 }
  0xfb   : > { %1244 = vrot.lane.b32.xlu1 %v1163_v10, %s3120_s23  ;;  %1252 = vrot.lane.b32.xlu2 %v1211_v32, %s3120_s23  ;;  %v2612_v10 = vld [vmem:[%s3169_s19 + $0x38] sm:$0x1] }
  0xfc   : > { %1891 = vrot.lane.b32.xlu0 %v1850_v17, %s3124_s27  ;;  %v1619_v17 = vrot.slane %v2909_v35, 1  ;;  %v1066_v23 = vrot.slane %v1064_v62, 1  ;;  %v4060_v61 = vpack.c.b16 %v1278_v53, %v1278_v53 }
  0xfd   : > { %v981_v45 = vpop.permute.xlu1 %980  ;;  %v4005_v30 = vpop.permute.xlu2 %1777 }
  0xfe   : > { %v4009_v63 = vsel %vm1979_vm4, %v3867_v9, %v981_v45  ;;  %v979_v12 = vpop.permute.xlu0 %978  ;;  %v3059_v9 = vor.u32 %v3058_v44, %v4536_v43  ;;  %v1620_v44 = vrot.slane %v4539_v4, 1  ;;  %v1274_v45 = vunpack.c.l.b16 %v2612_v10 }
  0xff   : > { %v4015_v20 = vsel %vm1979_vm4, %v3731_v41, %v979_v12  ;;  %v2955_v41 = vld [vmem:[%s3169_s19 + $0xc0] sm:$0xf0]  ;;  %v1749_v12 = vsel %vm1576_vm3, %v1747_v38, %v1748_v58  ;;  %v1384_v34 = vshll.u32 %v4060_v61, 16 }
 0x100   : > { %v1735_v19 = vrot.slane %v3059_v9, 1  ;;  %v2957_v16 = vor.u32 %v2956_v54, %v2955_v41  ;;  %v1621_v21 = vsel %vm1576_vm3, %v1619_v17, %v1620_v44  ;;  %v1062_v9 = vor.u32 %v1061_v37, %v1057_v33 }
 0x101   : > { %v4054_v15 = vpack.c.b16 %v1274_v45, %v1274_v45  ;;  %v1112_v44 = vshll.u32 %v4058_v59, 16  ;;  %v1386_v62 = vrot.slane %v1384_v34, 1  ;;  %v2005_v45 = vsel %vm1979_vm4, %v3824_v14, %v3882_v31  ;;  %v4542_v31 = vld [vmem:[#allocation3_spill] sm:$0xff]  ;;  %v3067_v34 = vld [vmem:[%s3169_s19 + $0x54] sm:$0xe] }
 0x102   : > { %v1737_v46 = vsel %vm1576_vm3, %v1735_v19, %v1736_v26  ;;  %v1875_v43 = vrot.slane %v2957_v16, 1  ;;  %v1864_v19 = vrot.slane %v3973_v36, 1  ;;  %v1067_v58 = vsel %vm759_vm0, %v1062_v9, %v1066_v23  ;;  %v4541_v9 = vld [vmem:[#allocation32_spill] sm:$0xff] }
 0x103   : > { %1524 = vrot.lane.b32.xlu1 %v1483_v3, %s3121_s24  ;;  %1645 = vrot.lane.b32.xlu2 %v1609_v0, %s3122_s25  ;;  %v2951_v3 = vor.u32 %v2950_v5, %v2949_v27  ;;  %v1876_v0 = vrot.slane %v3967_v6, 1  ;;  %v1336_v10 = vshll.u32 %v4054_v15, 16  ;;  %v2895_v27 = vld [vmem:[%s3169_s19 + $0x48] sm:$0xf0]  ;;  %v2896_v5 = vld [vmem:[%s3169_s19 + $0x48] sm:$0xe]  ;;  %v2038_v53 = vsel %vm2012_vm6, %v2005_v45, %v3945_v13 }
 0x104   : > { %1516 = vrot.lane.b32.xlu0 %v1435_v24, %s3121_s24  ;;  %v4540_v24 = vld [vmem:[#allocation4_spill] sm:$0xff]  ;;  %v1114_v37 = vrot.slane %v1112_v44, 1  ;;  %v3065_v23 = vor.u32 %v3064_v11, %v4542_v31 }
 0x105   : > { %v4035_v32 = vpop.permute.xlu1 %1240  ;;  %v4037_v60 = vpop.permute.xlu2 %1232  ;;  %v1107_v35 = vshll.u32 %v4540_v24, 16  ;;  %v1863_v54 = vrot.slane %v2951_v3, 1  ;;  %v1877_v38 = vsel %vm1576_vm3, %v1875_v43, %v1876_v0  ;;  %v1105_v17 = vshrl.u32 %v4540_v24, 16  ;;  %v2889_v0 = vld [vmem:[%s3169_s19 + $0x18] sm:$0xf0] }
 0x106   : > { %v4042_v42 = vpop.permute.xlu0 %1224  ;;  %v1338_v36 = vrot.slane %v1336_v10, 1  ;;  %v2897_v3 = vor.u32 %v2896_v5, %v2895_v27  ;;  %v2890_v43 = vld [vmem:[%s3169_s19 + $0x18] sm:$0xe]  ;;  %v2030_v49 = vsel %vm2012_vm6, %v1997_v18, %v4035_v32  ;;  %v1711_v32 = vrot.slane %v3065_v23, 1  ;;  %v2937_v11 = vld [vmem:[%s3169_s19 + $0x30] sm:$0xf0] }
 0x107   : > { %v1109_v4 = vrot.slane %v1107_v35, 1  ;;  %v1865_v16 = vsel %vm1576_vm3, %v1863_v54, %v1864_v19  ;;  %v4543_v35 = vld [vmem:[#allocation37_spill] sm:$0xff]  ;;  %v4544_v54 = vld [vmem:[#allocation31_spill] sm:$0xff]  ;;  %v2621_v18 = vld [vmem:[%s3169_s19 + $0xa4] sm:$0x1] }
 0x108   : > { %v1339_v14 = vsel %vm759_vm0, %v4541_v9, %v1338_v36  ;;  %v1387_v39 = vsel %vm759_vm0, %v4543_v35, %v1386_v62  ;;  %v1596_v19 = vrot.slane %v4544_v54, 1  ;;  %v2944_v36 = vld [vmem:[%s3169_s19 + $0x60] sm:$0xe]  ;;  %v2609_v27 = vld [vmem:[%s3169_s19 + $0xc8] sm:$0x1]  ;;  %v1283_v23 = vunpack.c.l.b16 %v2621_v18 }
 0x109   : > { %v1110_v33 = vor.u32 %v1109_v4, %v1105_v17  ;;  %v1595_v17 = vrot.slane %v2897_v3, 1  ;;  %v4545_v4 = vld [vmem:[#allocation26_spill] sm:$0xff]  ;;  %v2605_v3 = vld [vmem:[%s3169_s19 + $0x98] sm:$0x1] }
 0x10a   : > { %v1584_v44 = vrot.slane %v4545_v4, 1  ;;  %v4138_v4 = vpack.c.b16 %v1283_v23, %v1283_v23 }
 0x10b   : > { %1773 = vrot.lane.b32.xlu1 %v1737_v46, %s3123_s26  ;;  %1781 = vrot.lane.b32.xlu2 %v1749_v12, %s3123_s26  ;;  %v1115_v24 = vsel %vm759_vm0, %v1110_v33, %v1114_v37  ;;  %v1597_v31 = vsel %vm1576_vm3, %v1595_v17, %v1596_v19 }
 0x10c   : > { %1653 = vrot.lane.b32.xlu0 %v1621_v21, %s3122_s25 }
 0x10d   : > { %v1521_v41 = vpop.permute.xlu1 %1520  ;;  %v4062_v6 = vpop.permute.xlu2 %1625 }
 0x10e   : > { %v1513_v26 = vpop.permute.xlu0 %1512  ;;  %v2071_v13 = vsel %vm2045_vm7, %v2038_v53, %v1521_v41  ;;  %v1712_v41 = vrot.slane %v4029_v40, 1 }
 0x113   : > { %1909 = vrot.lane.b32.xlu1 %v1877_v38, %s3124_s27  ;;  %1228 = vrot.lane.b32.xlu2 %v1067_v58, %s3120_s23  ;;  %v2891_v38 = vor.u32 %v2890_v43, %v2889_v0  ;;  %v2063_v58 = vsel %vm2045_vm7, %v2030_v49, %v1513_v26  ;;  %v2943_v26 = vld [vmem:[%s3169_s19 + $0x60] sm:$0xf0]  ;;  %v1011_v49 = vunpack.c.l.b16 %v2605_v3 }
 0x114   : > { %1901 = vrot.lane.b32.xlu0 %v1865_v16, %s3124_s27  ;;  %v2938_v16 = vld [vmem:[%s3169_s19 + $0x30] sm:$0xe]  ;;  %v2096_v5 = vsel %vm2078_vm8, %v2063_v58, %v3970_v57  ;;  %v2945_v57 = vor.u32 %v2944_v36, %v2943_v26  ;;  %v1852_v58 = vrot.slane %v4060_v61, 1 }
 0x115   : > { %v1770_v46 = vpop.permute.xlu1 %1769  ;;  %v4081_v12 = vpop.permute.xlu2 %1761  ;;  %v1583_v45 = vrot.slane %v2891_v38, 1  ;;  %v2939_v43 = vor.u32 %v2938_v16, %v2937_v11  ;;  %v2625_v11 = vld [vmem:[%s3169_s19 + $0xd4] sm:$0x1] }
 0x116   : > { %v1650_v21 = vpop.permute.xlu0 %1649  ;;  %v2129_v40 = vsel %vm2111_vm9, %v2096_v5, %v1770_v46  ;;  %v1851_v38 = vrot.slane %v2945_v57, 1 }
 0x117   : > { %v2104_v10 = vsel %vm2078_vm8, %v2071_v13, %v1650_v21  ;;  %v1585_v46 = vsel %vm1576_vm3, %v1583_v45, %v1584_v44  ;;  %v1840_v13 = vrot.slane %v4054_v15, 1  ;;  %v1839_v54 = vrot.slane %v2939_v43, 1  ;;  %v4548_v43 = vld [vmem:[#allocation23_spill] sm:$0xff] }
 0x118   : > { %v2137_v62 = vsel %vm2111_vm9, %v2104_v10, %v4005_v30  ;;  %v1713_v30 = vsel %vm1576_vm3, %v1711_v32, %v1712_v41  ;;  %v4547_v10 = vld [vmem:[#allocation19_spill] sm:$0xff]  ;;  %v1724_v32 = vrot.slane %v4058_v59, 1  ;;  %v4143_v41 = vpack.c.b16 %v1011_v49, %v1011_v49 }
 0x119   : > { %v1439_v17 = vshll.u32 %v4547_v10, 16  ;;  %v1841_v16 = vsel %vm1576_vm3, %v1839_v54, %v1840_v13  ;;  %v1853_v26 = vsel %vm1576_vm3, %v1851_v38, %v1852_v58  ;;  %v1287_v45 = vunpack.c.l.b16 %v2625_v11  ;;  %v4550_v58 = vld [vmem:[#allocation36_spill] sm:$0xff] }
 0x11a   : > { %v1172_v59 = vshll.u32 %v4143_v41, 16  ;;  %v1487_v57 = vshll.u32 %v4548_v43, 16 }
 0x11b   : > { %1500 = vrot.lane.b32.xlu1 %v1339_v14, %s3121_s24  ;;  %1508 = vrot.lane.b32.xlu2 %v1387_v39, %s3121_s24  ;;  %v1015_v14 = vunpack.c.l.b16 %v2609_v27  ;;  %v1437_v27 = vshrl.u32 %v4547_v10, 16  ;;  %v1441_v5 = vrot.slane %v1439_v17, 1 }
 0x11c   : > { %1236 = vrot.lane.b32.xlu0 %v1115_v24, %s3120_s23  ;;  %v4546_v24 = vld [vmem:[#allocation5_spill] sm:$0xff] }
 0x11d   : > { %v1906_v33 = vpop.permute.xlu1 %1905  ;;  %v4115_v37 = vpop.permute.xlu2 %1242  ;;  %v3068_v39 = vor.u32 %v3067_v34, %v4546_v24  ;;  %v4134_v19 = vpack.c.b16 %v1015_v14, %v1015_v14  ;;  %v2022_v24 = vsel %vm2012_vm6, %v3925_v55, %v4037_v60  ;;  %v1489_v55 = vrot.slane %v1487_v57, 1  ;;  %v3076_v60 = vld [vmem:[%s3169_s19 + $0x9c] sm:$0xe] }
 0x11e   : > { %v1898_v53 = vpop.permute.xlu0 %1897  ;;  %v2170_v21 = vsel %vm2144_vm10, %v2137_v62, %v1906_v33  ;;  %v1444_v33 = vshll.u32 %v4138_v4, 16  ;;  %v3070_v62 = vld [vmem:[%s3169_s19 + $0x84] sm:$0xe] }
 0x11f   : > { %v2162_v0 = vsel %vm2144_vm10, %v2129_v40, %v1898_v53  ;;  %2678 = vmatmul.msk.bf16.vlgmr.msra.gmra.mxu3 %vm2200_vm11, %v2170_v21  ;;  %v1723_v15 = vrot.slane %v3068_v39, 1  ;;  %v1220_v36 = vshll.u32 %v4134_v19, 16  ;;  %v3073_v40 = vld [vmem:[%s3169_s19 + $0xb4] sm:$0xe]  ;;  %v1442_v21 = vor.u32 %v1441_v5, %v1437_v27  ;;  %v4549_v39 = vld [vmem:[#allocation33_spill] sm:$0xff] }
 0x120   : > { %2674 = vmatmul.msk.bf16.vlgmr.msra.gmra.mxu2 %vm2200_vm11, %v2162_v0  ;;  %v1446_v3 = vrot.slane %v1444_v33, 1  ;;  %v4158_v0 = vpack.c.b16 %v1287_v45, %v1287_v45  ;;  %v3071_v49 = vor.u32 %v3070_v62, %v4549_v39  ;;  %v3074_v10 = vor.u32 %v3073_v40, %v4550_v58  ;;  %v2931_v45 = vld [vmem:[%s3169_s19 + $0xc0] sm:$0xf0] }
 0x121   : > { %v1725_v18 = vsel %vm1576_vm3, %v1723_v15, %v1724_v32  ;;  %v1222_v53 = vrot.slane %v1220_v36, 1 }
 0x122   : > { %v1447_v54 = vsel %vm759_vm0, %v1442_v21, %v1446_v3  ;;  %v1492_v38 = vshll.u32 %v4158_v0, 16  ;;  %v1610_v32 = vrot.slane %v3071_v49, 1  ;;  %v2925_v21 = vld [vmem:[%s3169_s19 + $0x90] sm:$0xf0]  ;;  %v2926_v3 = vld [vmem:[%s3169_s19 + $0x90] sm:$0xe] }
 0x123   : > { %1637 = vrot.lane.b32.xlu1 %v1597_v31, %s3122_s25  ;;  %1757 = vrot.lane.b32.xlu2 %v1713_v30, %s3123_s26  ;;  %v1174_v30 = vrot.slane %v1172_v59, 1  ;;  %v1223_v13 = vsel %vm759_vm0, %v3995_v47, %v1222_v53  ;;  %v2601_v59 = vld [vmem:[%s3169_s19 + $0x68] sm:$0x1]  ;;  %v2927_v39 = vor.u32 %v2926_v3, %v2925_v21  ;;  %v3079_v49 = vld [vmem:[%s3169_s19 + $0xcc] sm:$0xe] }
 0x124   : > { %1629 = vrot.lane.b32.xlu0 %v1585_v46, %s3122_s25  ;;  %v2014_v46 = vsel %vm2012_vm6, %v3766_v22, %v4042_v42  ;;  %v1485_v42 = vshrl.u32 %v4548_v43, 16  ;;  %v3082_v3 = vld [vmem:[%s3169_s19 + $0x24] sm:$0xe] }
 0x125   : > { %v1505_v44 = vpop.permute.xlu1 %1504  ;;  %v4140_v34 = vpop.permute.xlu2 %1522  ;;  %v1175_v22 = vsel %vm759_vm0, %v3535_v28, %v1174_v30  ;;  %v1494_v28 = vrot.slane %v1492_v38, 1 }
 0x126   : > { %v1497_v61 = vpop.permute.xlu0 %1496  ;;  %v2055_v17 = vsel %vm2045_vm7, %v2022_v24, %v1505_v44  ;;  %v4551_v44 = vld [vmem:[#allocation38_spill] sm:$0xff]  ;;  %v1490_v62 = vor.u32 %v1489_v55, %v1485_v42  ;;  %v1738_v55 = vrot.slane %v2927_v39, 1  ;;  %v4556_v39 = vld [vmem:[#allocation21_spill] sm:$0xff] }
 0x127   : > { %v2047_v15 = vsel %vm2045_vm7, %v2014_v46, %v1497_v61  ;;  %v1611_v11 = vrot.slane %v4551_v44, 1  ;;  %v1623_v61 = vrot.slane %v3530_v50, 1  ;;  %v1007_v46 = vunpack.c.l.b16 %v2601_v59 }
 0x128   : > { %v2080_v36 = vsel %vm2078_vm8, %v2047_v15, %v4062_v6  ;;  %v1495_v24 = vsel %vm759_vm0, %v1490_v62, %v1494_v28 }
 0x129   : > { %v1612_v43 = vsel %vm1576_vm3, %v1610_v32, %v1611_v11  ;;  %v2613_v32 = vld [vmem:[%s3169_s19 + $0x44] sm:$0x1] }
 0x12b   : > { %1885 = vrot.lane.b32.xlu1 %v1841_v16, %s3124_s27  ;;  %1893 = vrot.lane.b32.xlu2 %v1853_v26, %s3124_s27  ;;  %v1622_v16 = vrot.slane %v3074_v10, 1  ;;  %v2597_v26 = vld [vmem:[%s3169_s19 + $0x38] sm:$0x1]  ;;  %v1867_v10 = vrot.slane %v4138_v4, 1 }
 0x12c   : > { %1765 = vrot.lane.b32.xlu0 %v1725_v18, %s3123_s26  ;;  %v2932_v18 = vld [vmem:[%s3169_s19 + $0xc0] sm:$0xe]  ;;  %v1003_v57 = vunpack.c.l.b16 %v2597_v26 }
 0x12d   : > { %v1754_v14 = vpop.permute.xlu1 %1753  ;;  %v4161_v31 = vpop.permute.xlu2 %1771  ;;  %v2933_v30 = vor.u32 %v2932_v18, %v2931_v45  ;;  %v4555_v45 = vld [vmem:[#allocation12_spill] sm:$0xff] }
 0x12e   : > { %v1634_v23 = vpop.permute.xlu0 %1633  ;;  %v2113_v40 = vsel %vm2111_vm9, %v2080_v36, %v1754_v14  ;;  %v4552_v14 = vld [vmem:[#allocation20_spill] sm:$0xff]  ;;  %v1275_v36 = vunpack.c.l.b16 %v2613_v32  ;;  %v1343_v18 = vshll.u32 %v4555_v45, 16 }
 0x12f   : > { %v2088_v47 = vsel %vm2078_vm8, %v2055_v17, %v1634_v23  ;;  %v3077_v23 = vor.u32 %v3076_v60, %v4552_v14  ;;  %v1750_v38 = vrot.slane %v2933_v30, 1  ;;  %v4216_v17 = vpack.c.b16 %v1007_v46, %v1007_v46 }
 0x130   : > { %v2121_v33 = vsel %vm2111_vm9, %v2088_v47, %v4081_v12  ;;  %v1624_v12 = vsel %vm1576_vm3, %v1622_v16, %v1623_v61  ;;  %v1739_v60 = vrot.slane %v4143_v41, 1  ;;  %v4553_v61 = vld [vmem:[#allocation24_spill] sm:$0xff]  ;;  %v4554_v41 = vld [vmem:[#allocation14_spill] sm:$0xff]  ;;  %v4237_v21 = vpack.c.b16 %v1275_v36, %v1275_v36 }
 0x131   : > { %v1866_v58 = vrot.slane %v3077_v23, 1  ;;  %v1124_v4 = vshll.u32 %v4216_v17, 16  ;;  %v3080_v26 = vor.u32 %v3079_v49, %v4553_v61  ;;  %v1341_v46 = vshrl.u32 %v4555_v45, 16  ;;  %v2920_v36 = vld [vmem:[%s3169_s19 + $0x60] sm:$0xe] }
 0x132   : > { %v1740_v16 = vsel %vm1576_vm3, %v1738_v55, %v1739_v60  ;;  %v4557_v55 = vld [vmem:[#allocation27_spill] sm:$0xff] }
 0x133   : > { %1254 = vrot.lane.b32.xlu1 %v1223_v13, %s3120_s23  ;;  %1518 = vrot.lane.b32.xlu2 %v1447_v54, %s3121_s24  ;;  %v1751_v13 = vrot.slane %v4134_v19, 1  ;;  %v4212_v54 = vpack.c.b16 %v1003_v57, %v1003_v57  ;;  %v1868_v28 = vsel %vm1576_vm3, %v1866_v58, %v1867_v10  ;;  %v1126_v59 = vrot.slane %v1124_v4, 1  ;;  %v3085_v58 = vld [vmem:[%s3169_s19 + $0x54] sm:$0xe] }
 0x134   : > { %1246 = vrot.lane.b32.xlu0 %v1175_v22, %s3120_s23  ;;  %v2617_v22 = vld [vmem:[%s3169_s19 + $0x74] sm:$0x1]  ;;  %v1587_v60 = vrot.slane %v4557_v55, 1 }
 0x135   : > { %v1890_v27 = vpop.permute.xlu1 %1889  ;;  %v4190_v5 = vpop.permute.xlu2 %1907  ;;  %v1076_v19 = vshll.u32 %v4212_v54, 16  ;;  %v1279_v44 = vunpack.c.l.b16 %v2617_v22  ;;  %v1752_v11 = vsel %vm1576_vm3, %v1750_v38, %v1751_v13 }
 0x136   : > { %v1882_v53 = vpop.permute.xlu0 %1881  ;;  %v2154_v50 = vsel %vm2144_vm10, %v2121_v33, %v1890_v27  ;;  %v1391_v27 = vshll.u32 %v4554_v41, 16 }
 0x137   : > { %v2146_v6 = vsel %vm2144_vm10, %v2113_v40, %v1882_v53  ;;  %2670 = vmatmul.msk.bf16.vlgmr.msra.gmra.mxu1 %vm2200_vm11, %v2154_v50  ;;  %v1078_v33 = vrot.slane %v1076_v19, 1  ;;  %v4232_v62 = vpack.c.b16 %v1279_v44, %v1279_v44  ;;  %v1878_v53 = vrot.slane %v3080_v26, 1  ;;  %v2913_v44 = vld [vmem:[%s3169_s19 + $0x30] sm:$0xf0]  ;;  %v2919_v26 = vld [vmem:[%s3169_s19 + $0x60] sm:$0xf0] }
 0x138   : > { %2666 = vmatmul.msk.bf16.vlgmr.msra.gmra.mxu0 %vm2200_vm11, %v2146_v6  ;;  %v1879_v50 = vrot.slane %v4158_v0, 1  ;;  %v2032_v6 = vsel %vm2012_vm6, %v3863_v51, %v4115_v37  ;;  %v1393_v30 = vrot.slane %v1391_v27, 1  ;;  %v1127_v0 = vsel %vm759_vm0, %v4543_v35, %v1126_v59 }
 0x139   : > { %v1079_v57 = vsel %vm759_vm0, %v4541_v9, %v1078_v33  ;;  %v1396_v14 = vshll.u32 %v4232_v62, 16  ;;  %v3083_v51 = vor.u32 %v3082_v3, %v4556_v39  ;;  %v1348_v9 = vshll.u32 %v4237_v21, 16 }
 0x13a   : > { %v1880_v49 = vsel %vm1576_vm3, %v1878_v53, %v1879_v50  ;;  %v2921_v33 = vor.u32 %v2920_v36, %v2919_v26  ;;  %v3091_v50 = vld [vmem:[%s3169_s19 + $0x3c] sm:$0xe]  ;;  %v1715_v3 = vrot.slane %v4212_v54, 1 }
 0x13b   : > { %1647 = vrot.lane.b32.xlu1 %v1612_v43, %s3122_s25  ;;  %1655 = vrot.lane.b32.xlu2 %v1624_v12, %s3122_s25  ;;  %v1389_v12 = vshrl.u32 %v4554_v41, 16  ;;  %v1398_v10 = vrot.slane %v1396_v14, 1  ;;  %v1350_v19 = vrot.slane %v1348_v9, 1 }
 0x13c   : > { %1526 = vrot.lane.b32.xlu0 %v1495_v24, %s3121_s24  ;;  %v1345_v24 = vrot.slane %v1343_v18, 1  ;;  %v4558_v18 = vld [vmem:[#allocation30_spill] sm:$0xff] }
 0x13d   : > { %v1515_v42 = vpop.permute.xlu1 %1514  ;;  %v4220_v47 = vpop.permute.xlu2 %1498  ;;  %v1394_v35 = vor.u32 %v1393_v30, %v1389_v12  ;;  %v3086_v59 = vor.u32 %v3085_v58, %v4558_v18  ;;  %v4559_v30 = vld [vmem:[#allocation34_spill] sm:$0xff] }
 0x13e   : > { %v1251_v15 = vpop.permute.xlu0 %1250  ;;  %v2065_v37 = vsel %vm2045_vm7, %v2032_v6, %v1515_v42  ;;  %v1346_v22 = vor.u32 %v1345_v24, %v1341_v46  ;;  %v1586_v42 = vrot.slane %v3083_v51, 1  ;;  %v1726_v6 = vrot.slane %v2921_v33, 1  ;;  %v4560_v24 = vld [vmem:[#allocation15_spill] sm:$0xff] }
 0x13f   : > { %v2040_v13 = vsel %vm2012_vm6, %v4015_v20, %v1251_v15  ;;  %v1598_v12 = vrot.slane %v3086_v59, 1  ;;  %v1599_v14 = vrot.slane %v4559_v30, 1 }
 0x140   : > { %v2073_v20 = vsel %vm2045_vm7, %v2040_v13, %v4140_v34  ;;  %v1399_v34 = vsel %vm759_vm0, %v1394_v35, %v1398_v10  ;;  %v1588_v27 = vsel %vm1576_vm3, %v1586_v42, %v1587_v60  ;;  %v1351_v45 = vsel %vm759_vm0, %v1346_v22, %v1350_v19 }
 0x141   : > { %v1600_v54 = vsel %vm1576_vm3, %v1598_v12, %v1599_v14  ;;  %v1855_v13 = vrot.slane %v4232_v62, 1  ;;  %v1843_v35 = vrot.slane %v4237_v21, 1 }
 0x143   : > { %1783 = vrot.lane.b32.xlu1 %v1752_v11, %s3123_s26  ;;  %1903 = vrot.lane.b32.xlu2 %v1868_v28, %s3124_s27  ;;  %v2914_v11 = vld [vmem:[%s3169_s19 + $0x30] sm:$0xe] }
 0x144   : > { %1775 = vrot.lane.b32.xlu0 %v1740_v16, %s3123_s26  ;;  %v2915_v41 = vor.u32 %v2914_v11, %v2913_v44 }
 0x145   : > { %v1652_v40 = vpop.permute.xlu1 %1651  ;;  %v4247_v23 = vpop.permute.xlu2 %1635 }
 0x146   : > { %v1644_v43 = vpop.permute.xlu0 %1643  ;;  %v2106_v28 = vsel %vm2078_vm8, %v2073_v20, %v1652_v40  ;;  %v3088_v40 = vld [vmem:[%s3169_s19 + $0x6c] sm:$0xe] }
 0x147   : > { %v2098_v38 = vsel %vm2078_vm8, %v2065_v37, %v1644_v43  ;;  %v1727_v43 = vrot.slane %v4216_v17, 1  ;;  %v3089_v39 = vor.u32 %v3088_v40, %v4560_v24  ;;  %v4561_v37 = vld [vmem:[#allocation13_spill] sm:$0xff] }
 0x148   : > { %v2131_v32 = vsel %vm2111_vm9, %v2098_v38, %v4161_v31 }
 0x149   : > { %v1728_v51 = vsel %vm1576_vm3, %v1726_v6, %v1727_v43  ;;  %v1854_v9 = vrot.slane %v3089_v39, 1 }
 0x14b   : > { %1230 = vrot.lane.b32.xlu1 %v1079_v57, %s3120_s23  ;;  %1238 = vrot.lane.b32.xlu2 %v1127_v0, %s3120_s23  ;;  %v1856_v22 = vsel %vm1576_vm3, %v1854_v9, %v1855_v13 }
 0x14c   : > { %1911 = vrot.lane.b32.xlu0 %v1880_v49, %s3124_s27  ;;  %v3092_v49 = vor.u32 %v3091_v50, %v4561_v37 }
 0x14d   : > { %v1900_v15 = vpop.permute.xlu1 %1899  ;;  %v1884_v53 = vpop.permute.xlu2 %1883 }
 0x14e   : > { %v1780_v4 = vpop.permute.xlu0 %1779  ;;  %v2164_v16 = vsel %vm2144_vm10, %v2131_v32, %v1900_v15  ;;  %v1842_v58 = vrot.slane %v3092_v49, 1 }
 0x14f   : > { %v2139_v61 = vsel %vm2111_vm9, %v2106_v28, %v1780_v4  ;;  %2675 = vmatmul.msk.bf16.gmra.mxu2 %vm2200_vm11, %v2164_v16 }
 0x150   : > { %v2172_v31 = vsel %vm2144_vm10, %v2139_v61, %v4190_v5  ;;  %v1714_v5 = vrot.slane %v2915_v41, 1  ;;  %v1844_v42 = vsel %vm1576_vm3, %v1842_v58, %v1843_v35  ;;  %v4352_v58 = vld [vmem:[%s4447_s2] ss:$0 sm:$0xff] }
 0x151   : > { %2679 = vmatmul.msk.bf16.gmra.mxu3 %vm2200_vm11, %v2172_v31 }
 0x152   : > { %v1716_v46 = vsel %vm1576_vm3, %v1714_v5, %v1715_v3 }
 0x153   : > { %1510 = vrot.lane.b32.xlu1 %v1399_v34, %s3121_s24  ;;  %1631 = vrot.lane.b32.xlu2 %v1588_v27, %s3122_s25 }
 0x154   : > { %1502 = vrot.lane.b32.xlu0 %v1351_v45, %s3121_s24 }
 0x155   : > { %v1235_v57 = vpop.permute.xlu1 %1234  ;;  %v1253_v17 = vpop.permute.xlu2 %1252 }
 0x156   : > { %v1227_v0 = vpop.permute.xlu0 %1226  ;;  %v2024_v44 = vsel %vm2012_vm6, %v3915_v7, %v1235_v57  ;;  %v2042_v41 = vsel %vm2012_vm6, %v4009_v63, %v1253_v17 }
 0x157   : > { %v2016_v55 = vsel %vm2012_vm6, %v3892_v56, %v1227_v0 }
 0x158   : > { %v2049_v60 = vsel %vm2045_vm7, %v2016_v55, %v4220_v47 }
 0x15b   : > { %1759 = vrot.lane.b32.xlu1 %v1716_v46, %s3123_s26  ;;  %1767 = vrot.lane.b32.xlu2 %v1728_v51, %s3123_s26 }
 0x15c   : > { %1639 = vrot.lane.b32.xlu0 %v1600_v54, %s3122_s25 }
 0x15d   : > { %v1628_v38 = vpop.permute.xlu1 %1627  ;;  %v1646_v15 = vpop.permute.xlu2 %1645 }
 0x15e   : > { %v1507_v10 = vpop.permute.xlu0 %1506  ;;  %v2082_v20 = vsel %vm2078_vm8, %v2049_v60, %v1628_v38 }
 0x15f   : > { %v2057_v56 = vsel %vm2045_vm7, %v2024_v44, %v1507_v10 }
 0x160   : > { %v2090_v11 = vsel %vm2078_vm8, %v2057_v56, %v4247_v23 }
 0x163   : > { %1895 = vrot.lane.b32.xlu1 %v1856_v22, %s3124_s27 }
 0x164   : > { %1887 = vrot.lane.b32.xlu0 %v1844_v42, %s3124_s27 }
 0x165   : > { %v1764_v62 = vpop.permute.xlu1 %1763  ;;  %v1782_v61 = vpop.permute.xlu2 %1781 }
 0x166   : > { %v1756_v21 = vpop.permute.xlu0 %1755  ;;  %v2123_v28 = vsel %vm2111_vm9, %v2090_v11, %v1764_v62 }
 0x167   : > { %v2115_v32 = vsel %vm2111_vm9, %v2082_v20, %v1756_v21 }
 0x168   : > { %v2148_v19 = vsel %vm2144_vm10, %v2115_v32, %v1884_v53 }
 0x169   : > { %2667 = vmatmul.msk.bf16.gmra.mxu0 %vm2200_vm11, %v2148_v19 }
 0x16d   : > { %v1245_v47 = vpop.permute.xlu1 %1244  ;;  %v1229_v36 = vpop.permute.xlu2 %1228 }
 0x16e   : > { %v1892_v4 = vpop.permute.xlu0 %1891  ;;  %v2034_v23 = vsel %vm2012_vm6, %v3983_v2, %v1245_v47  ;;  %v2018_v30 = vsel %vm2012_vm6, %v3888_v48, %v1229_v36 }
 0x16f   : > { %v2156_v16 = vsel %vm2144_vm10, %v2123_v28, %v1892_v4 }
 0x170   : > { %2671 = vmatmul.msk.bf16.gmra.mxu1 %vm2200_vm11, %v2156_v16 }
 0x175   : > { %v1525_v34 = vpop.permute.xlu1 %1524  ;;  %v1509_v18 = vpop.permute.xlu2 %1508 }
 0x176   : > { %v1517_v26 = vpop.permute.xlu0 %1516  ;;  %v2075_v27 = vsel %vm2045_vm7, %v2042_v41, %v1525_v34 }
 0x177   : > { %v2067_v33 = vsel %vm2045_vm7, %v2034_v23, %v1517_v26 }
 0x178   : > { %v2100_v59 = vsel %vm2078_vm8, %v2067_v33, %v1646_v15 }
 0x17d   : > { %v1774_v7 = vpop.permute.xlu1 %1773  ;;  %v1758_v6 = vpop.permute.xlu2 %1757 }
 0x17e   : > { %v1654_v31 = vpop.permute.xlu0 %1653  ;;  %v2133_v50 = vsel %vm2111_vm9, %v2100_v59, %v1774_v7 }
 0x17f   : > { %v2108_v45 = vsel %vm2078_vm8, %v2075_v27, %v1654_v31 }
 0x180   : > { %v2141_v53 = vsel %vm2111_vm9, %v2108_v45, %v1782_v61 }
 0x185   : > { %v1910_v40 = vpop.permute.xlu1 %1909  ;;  %v1894_v14 = vpop.permute.xlu2 %1893 }
 0x186   : > { %v1902_v3 = vpop.permute.xlu0 %1901  ;;  %v2174_v63 = vsel %vm2144_vm10, %v2141_v53, %v1910_v40 }
 0x187   : > { %v2166_v5 = vsel %vm2144_vm10, %v2133_v50, %v1902_v3  ;;  %2680 = vmatmul.msk.bf16.gmra.mxu3 %vm2200_vm11, %v2174_v63 }
 0x188   : > { %2676 = vmatmul.msk.bf16.gmra.mxu2 %vm2200_vm11, %v2166_v5 }
 0x18d   : > { %v1501_v2 = vpop.permute.xlu1 %1500 }
 0x18e   : > { %v1237_v43 = vpop.permute.xlu0 %1236  ;;  %v2051_v0 = vsel %vm2045_vm7, %v2018_v30, %v1501_v2 }
 0x18f   : > { %v2026_v46 = vsel %vm2012_vm6, %v3827_v25, %v1237_v43  ;;  %v1519_v25 = vpop.permute.xlu2 %1518 }
 0x190   : > { %v2059_v39 = vsel %vm2045_vm7, %v2026_v46, %v1509_v18 }
 0x195   : > { %v1638_v57 = vpop.permute.xlu1 %1637 }
 0x196   : > { %v1630_v12 = vpop.permute.xlu0 %1629  ;;  %v2092_v37 = vsel %vm2078_vm8, %v2059_v39, %v1638_v57 }
 0x197   : > { %v2084_v24 = vsel %vm2078_vm8, %v2051_v0, %v1630_v12  ;;  %v1656_v20 = vpop.permute.xlu2 %1655 }
 0x198   : > { %v2117_v54 = vsel %vm2111_vm9, %v2084_v24, %v1758_v6 }
 0x19d   : > { %v1886_v51 = vpop.permute.xlu1 %1885 }
 0x19e   : > { %v1766_v49 = vpop.permute.xlu0 %1765  ;;  %v2150_v17 = vsel %vm2144_vm10, %v2117_v54, %v1886_v51 }
 0x19f   : > { %v2125_v48 = vsel %vm2111_vm9, %v2092_v37, %v1766_v49  ;;  %2668 = vmatmul.msk.bf16.gmra.mxu0 %vm2200_vm11, %v2150_v17  ;;  %v1904_v36 = vpop.permute.xlu2 %1903 }
 0x1a0   : > { %v2158_v9 = vsel %vm2144_vm10, %v2125_v48, %v1894_v14 }
 0x1a1   : > { %2672 = vmatmul.msk.bf16.gmra.mxu1 %vm2200_vm11, %v2158_v9 }
 0x1a2   : > { %v2306_v13 = vpop.f32.mrf.mxu3 }
 0x1a3   : > { %v2286_v38 = vpop.f32.mrf.mxu2  ;;  %v2307_v22 = vadd.f32 %v4352_v58, %v2306_v13 }
 0x1a4   : > { %v2287_v42 = vadd.f32 %v4352_v58, %v2286_v38 }
 0x1a5   : > { %v1255_v35 = vpop.permute.xlu1 %1254  ;;  %v2350_v21 = vmax.f32 %v2307_v22, 0.0 }
 0x1a6   : > { %v1247_v10 = vpop.permute.xlu0 %1246  ;;  %v2342_v44 = vmax.f32 %v2287_v42, 0.0  ;;  %v2044_v27 = vsel %vm2012_vm6, %v3918_v52, %v1255_v35 }
 0x1a7   : > { %v2036_v4 = vsel %vm2012_vm6, %v3979_v29, %v1247_v10  ;;  %v1239_v43 = vpop.permute.xlu2 %1238 }
 0x1a8   : > { %v2069_v61 = vsel %vm2045_vm7, %v2036_v4, %v1519_v25  ;;  %v2028_v54 = vsel %vm2012_vm6, %v3954_v1, %v1239_v43 }
 0x1aa   : > { %v2308_v55 = vpop.f32.mrf.mxu3 }
 0x1ab   : > { %v2288_v60 = vpop.f32.mrf.mxu2  ;;  %v2309_v62 = vadd.f32 %v4352_v58, %v2308_v55 }
 0x1ac   : > { %v2289_v15 = vadd.f32 %v4352_v58, %v2288_v60 }
 0x1ad   : > { %v2351_v32 = vmax.f32 %v2309_v62, 0.0  ;;  %v1648_v19 = vpop.permute.xlu1 %1647 }
 0x1ae   : > { %v2343_v56 = vmax.f32 %v2289_v15, 0.0  ;;  %v1527_v11 = vpop.permute.xlu0 %1526  ;;  %v2102_v7 = vsel %vm2078_vm8, %v2069_v61, %v1648_v19 }
 0x1af   : > { %v2846_v47 = vpack.c.bf16 %v2351_v32, %v2350_v21  ;;  %v2077_v29 = vsel %vm2045_vm7, %v2044_v27, %v1527_v11  ;;  %v1632_v24 = vpop.permute.xlu2 %1631 }
 0x1b0   : > { %v2826_v28 = vpack.c.bf16 %v2343_v56, %v2342_v44  ;;  %v2110_v59 = vsel %vm2078_vm8, %v2077_v29, %v1656_v20 }
 0x1b1   : > { %2969 = vst [vmem:[%s4362_s16 + $0x60] sm:$0xff] %v2846_v47  }
 0x1b2   : > { %2965 = vst [vmem:[%s4362_s16 + $0x40] sm:$0xff] %v2826_v28  }
 0x1b4   : > { %v2266_v16 = vpop.f32.mrf.mxu1 }
 0x1b5   : > { %v2246_v34 = vpop.f32.mrf.mxu0  ;;  %v1784_v26 = vpop.permute.xlu1 %1783  ;;  %v2267_v33 = vadd.f32 %v4352_v58, %v2266_v16 }
 0x1b6   : > { %v1776_v31 = vpop.permute.xlu0 %1775  ;;  %v2247_v45 = vadd.f32 %v4352_v58, %v2246_v34  ;;  %v2143_v3 = vsel %vm2111_vm9, %v2110_v59, %v1784_v26 }
 0x1b7   : > { %v2135_v41 = vsel %vm2111_vm9, %v2102_v7, %v1776_v31  ;;  %v2334_v5 = vmax.f32 %v2267_v33, 0.0  ;;  %v1768_v9 = vpop.permute.xlu2 %1767 }
 0x1b8   : > { %v2168_v23 = vsel %vm2144_vm10, %v2135_v41, %v1904_v36  ;;  %v2326_v57 = vmax.f32 %v2247_v45, 0.0 }
 0x1b9   : > { %2677 = vmatmul.msk.bf16.gmra.mxu2 %vm2200_vm11, %v2168_v23 }
 0x1bc   : > { %v2268_v18 = vpop.f32.mrf.mxu1 }
 0x1bd   : > { %v2248_v40 = vpop.f32.mrf.mxu0  ;;  %v2269_v53 = vadd.f32 %v4352_v58, %v2268_v18  ;;  %v1231_v50 = vpop.permute.xlu1 %1230 }
 0x1be   : > { %v2249_v52 = vadd.f32 %v4352_v58, %v2248_v40  ;;  %v1912_v63 = vpop.permute.xlu0 %1911  ;;  %v2020_v37 = vsel %vm2012_vm6, %v3799_v8, %v1231_v50 }
 0x1bf   : > { %v2335_v2 = vmax.f32 %v2269_v53, 0.0  ;;  %v2176_v6 = vsel %vm2144_vm10, %v2143_v3, %v1912_v63 }
 0x1c0   : > { %v2327_v12 = vmax.f32 %v2249_v52, 0.0  ;;  %2681 = vmatmul.msk.bf16.gmra.mxu3 %vm2200_vm11, %v2176_v6 }
 0x1c1   : > { %v2806_v30 = vpack.c.bf16 %v2335_v2, %v2334_v5 }
 0x1c2   : > { %v2786_v14 = vpack.c.bf16 %v2327_v12, %v2326_v57 }
 0x1c3   : > { %2961 = vst [vmem:[%s4362_s16 + $0x20] sm:$0xff] %v2806_v30  }
 0x1c4   : > { %2787 = vst [vmem:[%s4362_s16] sm:$0xff] %v2786_v14  }
 0x1c5   : > { %v1511_v0 = vpop.permute.xlu1 %1510 }
 0x1c6   : > { %v1503_v46 = vpop.permute.xlu0 %1502  ;;  %v2061_v49 = vsel %vm2045_vm7, %v2028_v54, %v1511_v0 }
 0x1c7   : > { %v2053_v17 = vsel %vm2045_vm7, %v2020_v37, %v1503_v46 }
 0x1c8   : > { %v2086_v38 = vsel %vm2078_vm8, %v2053_v17, %v1632_v24 }
 0x1cd   : > { %v1760_v39 = vpop.permute.xlu1 %1759 }
 0x1ce   : > { %v1640_v51 = vpop.permute.xlu0 %1639  ;;  %v2119_v22 = vsel %vm2111_vm9, %v2086_v38, %v1760_v39 }
 0x1cf   : > { %v2094_v48 = vsel %vm2078_vm8, %v2061_v49, %v1640_v51 }
 0x1d0   : > { %v2127_v35 = vsel %vm2111_vm9, %v2094_v48, %v1768_v9 }
 0x1d2   : > { %v2291_v25 = vpop.f32.mrf.mxu2 }
 0x1d3   : > { %v2292_v55 = vadd.f32 %v4352_v58, %v2291_v25 }
 0x1d4   : > { %v2311_v13 = vpop.f32.mrf.mxu3 }
 0x1d5   : > { %v1896_v10 = vpop.permute.xlu1 %1895  ;;  %v2312_v62 = vadd.f32 %v4352_v58, %v2311_v13  ;;  %v2344_v21 = vmax.f32 %v2292_v55, 0.0 }
 0x1d6   : > { %v1888_v1 = vpop.permute.xlu0 %1887  ;;  %v2160_v8 = vsel %vm2144_vm10, %v2127_v35, %v1896_v10 }
 0x1d7   : > { %v2152_v42 = vsel %vm2144_vm10, %v2119_v22, %v1888_v1  ;;  %2673 = vmatmul.msk.bf16.gmra.mxu1 %vm2200_vm11, %v2160_v8  ;;  %v2352_v44 = vmax.f32 %v2312_v62, 0.0 }
 0x1d8   : > { %2669 = vmatmul.msk.bf16.gmra.mxu0 %vm2200_vm11, %v2152_v42 }
 0x1da   : > { %v2293_v60 = vpop.f32.mrf.mxu2 }
 0x1db   : > { %v2294_v20 = vadd.f32 %v4352_v58, %v2293_v60 }
 0x1dc   : > { %v2313_v15 = vpop.f32.mrf.mxu3 }
 0x1dd   : > { %v2345_v32 = vmax.f32 %v2294_v20, 0.0  ;;  %v2314_v19 = vadd.f32 %v4352_v58, %v2313_v15 }
 0x1df   : > { %v2831_v56 = vpack.c.bf16 %v2345_v32, %v2344_v21  ;;  %v2353_v11 = vmax.f32 %v2314_v19, 0.0 }
 0x1e1   : > { %2966 = vst [vmem:[%s4362_s16 + $0x48] sm:$0xff] %v2831_v56   ;;  %v2851_v47 = vpack.c.bf16 %v2353_v11, %v2352_v44 }
 0x1e3   : > { %2970 = vst [vmem:[%s4362_s16 + $0x68] sm:$0xff] %v2851_v47  }
 0x1e6   : > { %v2251_v28 = vpop.f32.mrf.mxu0 }
 0x1e7   : > { %v2252_v4 = vadd.f32 %v4352_v58, %v2251_v28 }
 0x1e9   : > { %v2328_v26 = vmax.f32 %v2252_v4, 0.0 }
 0x1ed   : > { %v2271_v16 = vpop.f32.mrf.mxu1 }
 0x1ee   : > { %v2253_v61 = vpop.f32.mrf.mxu0  ;;  %v2272_v31 = vadd.f32 %v4352_v58, %v2271_v16 }
 0x1ef   : > { %v2254_v34 = vadd.f32 %v4352_v58, %v2253_v61 }
 0x1f0   : > { %v2336_v27 = vmax.f32 %v2272_v31, 0.0 }
 0x1f1   : > { %v2329_v36 = vmax.f32 %v2254_v34, 0.0 }
 0x1f3   : > { %v2791_v7 = vpack.c.bf16 %v2329_v36, %v2328_v26 }
 0x1f5   : > { %2958 = vst [vmem:[%s4362_s16 + $0x8] sm:$0xff] %v2791_v7   ;;  %v2273_v41 = vpop.f32.mrf.mxu1 }
 0x1f6   : > { %v2274_v23 = vadd.f32 %v4352_v58, %v2273_v41 }
 0x1f8   : > { %v2337_v29 = vmax.f32 %v2274_v23, 0.0 }
 0x1fa   : > { %v2811_v33 = vpack.c.bf16 %v2337_v29, %v2336_v27 }
 0x1fc   : > { %2962 = vst [vmem:[%s4362_s16 + $0x28] sm:$0xff] %v2811_v33  }
 0x20a   : > { %v2316_v45 = vpop.f32.mrf.mxu3 }
 0x20b   : > { %v2296_v18 = vpop.f32.mrf.mxu2  ;;  %v2317_v59 = vadd.f32 %v4352_v58, %v2316_v45 }
 0x20c   : > { %v2297_v40 = vadd.f32 %v4352_v58, %v2296_v18 }
 0x20d   : > { %v2354_v63 = vmax.f32 %v2317_v59, 0.0 }
 0x20e   : > { %v2346_v2 = vmax.f32 %v2297_v40, 0.0 }
 0x212   : > { %v2318_v53 = vpop.f32.mrf.mxu3 }
 0x213   : > { %v2298_v50 = vpop.f32.mrf.mxu2  ;;  %v2319_v3 = vadd.f32 %v4352_v58, %v2318_v53 }
 0x214   : > { %v2299_v52 = vadd.f32 %v4352_v58, %v2298_v50 }
 0x215   : > { %v2355_v5 = vmax.f32 %v2319_v3, 0.0 }
 0x216   : > { %v2347_v6 = vmax.f32 %v2299_v52, 0.0 }
 0x217   : > { %v2856_v43 = vpack.c.bf16 %v2355_v5, %v2354_v63 }
 0x218   : > { %v2836_v57 = vpack.c.bf16 %v2347_v6, %v2346_v2 }
 0x219   : > { %2971 = vst [vmem:[%s4362_s16 + $0x70] sm:$0xff] %v2856_v43  }
 0x21a   : > { %2967 = vst [vmem:[%s4362_s16 + $0x50] sm:$0xff] %v2836_v57  }
 0x21c   : > { %v2256_v12 = vpop.f32.mrf.mxu0 }
 0x21d   : > { %v2257_v14 = vadd.f32 %v4352_v58, %v2256_v12 }
 0x21e   : > { %v2276_v30 = vpop.f32.mrf.mxu1 }
 0x21f   : > { %v2277_v46 = vadd.f32 %v4352_v58, %v2276_v30  ;;  %v2330_v51 = vmax.f32 %v2257_v14, 0.0 }
 0x221   : > { %v2338_v49 = vmax.f32 %v2277_v46, 0.0 }
 0x224   : > { %v2258_v0 = vpop.f32.mrf.mxu0 }
 0x225   : > { %v2259_v24 = vadd.f32 %v4352_v58, %v2258_v0 }
 0x226   : > { %v2278_v39 = vpop.f32.mrf.mxu1 }
 0x227   : > { %v2331_v54 = vmax.f32 %v2259_v24, 0.0  ;;  %v2279_v37 = vadd.f32 %v4352_v58, %v2278_v39 }
 0x229   : > { %v2796_v17 = vpack.c.bf16 %v2331_v54, %v2330_v51  ;;  %v2339_v48 = vmax.f32 %v2279_v37, 0.0 }
 0x22b   : > { %2959 = vst [vmem:[%s4362_s16 + $0x10] sm:$0xff] %v2796_v17   ;;  %v2816_v9 = vpack.c.bf16 %v2339_v48, %v2338_v49 }
 0x22d   : > { %2963 = vst [vmem:[%s4362_s16 + $0x30] sm:$0xff] %v2816_v9  }
 0x23c   : > { %v2301_v25 = vpop.f32.mrf.mxu2 }
 0x23d   : > { %v2302_v13 = vadd.f32 %v4352_v58, %v2301_v25 }
 0x23f   : > { %v2348_v22 = vmax.f32 %v2302_v13, 0.0 }
 0x243   : > { %v2321_v38 = vpop.f32.mrf.mxu3 }
 0x244   : > { %v2303_v35 = vpop.f32.mrf.mxu2  ;;  %v2322_v42 = vadd.f32 %v4352_v58, %v2321_v38 }
 0x245   : > { %v2304_v10 = vadd.f32 %v4352_v58, %v2303_v35 }
 0x246   : > { %v2356_v62 = vmax.f32 %v2322_v42, 0.0 }
 0x247   : > { %v2349_v1 = vmax.f32 %v2304_v10, 0.0 }
 0x249   : > { %v2841_v8 = vpack.c.bf16 %v2349_v1, %v2348_v22 }
 0x24b   : > { %2968 = vst [vmem:[%s4362_s16 + $0x58] sm:$0xff] %v2841_v8   ;;  %v2323_v55 = vpop.f32.mrf.mxu3 }
 0x24c   : > { %v2324_v60 = vadd.f32 %v4352_v58, %v2323_v55 }
 0x24e   : > { %v2357_v20 = vmax.f32 %v2324_v60, 0.0 }
 0x250   : > { %v2861_v15 = vpack.c.bf16 %v2357_v20, %v2356_v62 }
 0x252   : > { %2972 = vst [vmem:[%s4362_s16 + $0x78] sm:$0xff] %v2861_v15  }
 0x254   : > { %v2281_v21 = vpop.f32.mrf.mxu1 }
 0x255   : > { %v2261_v32 = vpop.f32.mrf.mxu0  ;;  %v2282_v19 = vadd.f32 %v4352_v58, %v2281_v21 }
 0x256   : > { %v2262_v44 = vadd.f32 %v4352_v58, %v2261_v32 }
 0x257   : > { %v2340_v4 = vmax.f32 %v2282_v19, 0.0 }
 0x258   : > { %v2332_v61 = vmax.f32 %v2262_v44, 0.0 }
 0x25c   : > { %v2283_v56 = vpop.f32.mrf.mxu1 }
 0x25d   : > { %v2263_v11 = vpop.f32.mrf.mxu0  ;;  %v2284_v47 = vadd.f32 %v4352_v58, %v2283_v56 }
 0x25e   : > { %v2264_v28 = vadd.f32 %v4352_v58, %v2263_v11 }
 0x25f   : > { %v2341_v16 = vmax.f32 %v2284_v47, 0.0 }
 0x260   : > { %v2333_v34 = vmax.f32 %v2264_v28, 0.0 }
 0x261   : > { %v2821_v26 = vpack.c.bf16 %v2341_v16, %v2340_v4 }
 0x262   : > { %v2801_v36 = vpack.c.bf16 %v2333_v34, %v2332_v61 }
 0x263   : > { %2964 = vst [vmem:[%s4362_s16 + $0x38] sm:$0xff] %v2821_v26  }
 0x264   : > { %2960 = vst [vmem:[%s4362_s16 + $0x18] sm:$0xff] %v2801_v36  }
 0x265 PF: > { %s13_s14 = sadd.s32 1, %s3115_s14   ;;  %s4562_s12 = smov %s3111_s13 }
 0x266   : > { %p10_p5 = scmp.ge.s32.totalorder %s13_s14, 4   ;;  %s4563_s13 = smov %s4565_s15 }
 0x268   :  { %12 = sbr.rel (!%p10_p5) target bundleno = 2 (0x2), region = 64 }

</bundles_post_ra>
